<compile_context>
chip_gen: v7x
topology: tpu7x:2x2x1
jax: 0.10.0
libtpu: 0.0.40
codegen_flags: <defaults>
</compile_context>

<pallas_src>
import math
from functools import partial

import jax
import jax.numpy as jnp
from jax.experimental import pallas as pl
from jax.experimental.pallas import tpu as pltpu


def _layer_norm(v, g, b):
  mu = jnp.mean(v, axis=-1, keepdims=True)
  var = jnp.mean(jnp.square(v - mu), axis=-1, keepdims=True)
  return (v - mu) * jax.lax.rsqrt(var + 1e-6) * g + b


def _transformer_block_kernel(
    xf_ref, mask_ref,
    ln1_g_ref, ln1_b_ref,
    wq_ref, bq_ref, wkv_ref, bkv_ref, wrel_ref, brel_ref,
    ln2_g_ref, ln2_b_ref,
    w1_ref, b1_ref, w2_ref, b2_ref,
    o_ref,
    k_sc, v_sc, attn_sc,
    *, heads, dh, rel_size, rel_window):
  """Fused TransformerBlock forward. Grid = (batch, query-tile)."""
  d = heads * dh
  s = xf_ref.shape[0]
  tq = o_ref.shape[0]
  qi = pl.program_id(1)

  ln1_g = ln1_g_ref[...]
  ln1_b = ln1_b_ref[...]

  # ---- once per batch element (first query tile): LN + fused K/V projection ----
  @pl.when(qi == 0)
  def _():
    xnf = _layer_norm(xf_ref[...], ln1_g, ln1_b).astype(jnp.bfloat16)
    kv = jnp.dot(xnf, wkv_ref[...],
                 preferred_element_type=jnp.float32) + bkv_ref[...]       # (S, 2D) f32
    # two unmasked lane-dense slab stores (no per-head strided vst.msk)
    k_sc[...] = kv[:, :d].astype(jnp.bfloat16)                            # (S, D)
    v_sc[...] = kv[:, d:].astype(jnp.bfloat16)                            # (S, D)

  # ---- per query tile: slice the tile out of the resident x block, LN + Q projection ----
  q0 = pl.multiple_of(qi * tq, tq)
  xq = xf_ref[pl.ds(q0, tq), :]                                           # (TQ, D) f32
  xnq = _layer_norm(xq, ln1_g, ln1_b).astype(jnp.bfloat16)
  # wq/bq already carry the 1/sqrt(D/heads) content-score scale (folded in the wrapper)
  q_bf = (jnp.dot(xnq, wq_ref[...], preferred_element_type=jnp.float32)
          + bq_ref[...]).astype(jnp.bfloat16)                             # (TQ, D)

  # head-invariant terms, generated on-chip and hoisted out of the head loop
  row = jax.lax.broadcasted_iota(jnp.int32, (tq, s), 0) + q0
  col = jax.lax.broadcasted_iota(jnp.int32, (tq, s), 1)
  doff = col - row                                                        # (TQ, S) int32
  mbias = jnp.broadcast_to(
      jnp.where(mask_ref[...] > 0.5, 0.0, -1e30), (tq, s))                # (TQ, S) f32

  wrel = wrel_ref[...]                                                    # (DH, R) bf16
  brel = brel_ref[...]                                                    # (1, R)  f32

  for h in range(heads):                      # static unroll; per-head MXU dots
    lo = h * dh
    qh = q_bf[:, lo:lo + dh]                                              # (TQ, DH) bf16
    kh = k_sc[:, lo:lo + dh]                                              # (S, DH)  bf16
    vh = v_sc[:, lo:lo + dh]                                              # (S, DH)  bf16
    # content scores: q @ k^T via dot_general dimension_numbers (no per-head k.T)
    scores = jax.lax.dot_general(qh, kh, (((1,), (1,)), ((), ())),
                                 preferred_element_type=jnp.float32)      # (TQ, S) f32
    # relative projection on the shared w_rel (sqrt(D/heads) folded in to undo q scaling)
    relh = jnp.dot(qh, wrel, preferred_element_type=jnp.float32) + brel   # (TQ, R) f32
    # position bias: torch.gather emulated with lazily generated selects (no big live masks)
    if rel_size == 1:
      pos = jnp.broadcast_to(relh[:, 0:1], (tq, s))
    else:
      pos = jnp.where(doff <= -rel_window, relh[:, 0:1], 0.0)             # left-clipped band
      pos = pos + jnp.where(doff >= rel_window,
                            relh[:, rel_size - 1:rel_size], 0.0)          # right-clipped band
      for k in range(1, rel_size - 1):                                    # interior offsets
        pos = pos + jnp.where(doff == k - rel_window, relh[:, k:k + 1], 0.0)

    scores = scores + pos + mbias
    m = jnp.max(scores, axis=-1, keepdims=True)
    p = jnp.exp(scores - m)
    l = jnp.sum(p, axis=-1, keepdims=True)
    attn = (p * pl.reciprocal(l, approx=True)).astype(jnp.bfloat16)
    attn_sc[:, lo:lo + dh] = jnp.dot(attn, vh,
                                     preferred_element_type=jnp.float32)  # (TQ, DH)

  x1 = xq + attn_sc[...]                                                  # residual 1

  # ---- LayerNorm + MLP, residual 2 ----
  x1n = _layer_norm(x1, ln2_g_ref[...], ln2_b_ref[...]).astype(jnp.bfloat16)
  hdn = jnp.dot(x1n, w1_ref[...], preferred_element_type=jnp.float32) + b1_ref[...]
  hdn = 0.5 * hdn * (1.0 + jax.lax.erf(hdn * (1.0 / math.sqrt(2.0))))     # exact GELU
  out = x1 + jnp.dot(hdn.astype(jnp.bfloat16), w2_ref[...],
                     preferred_element_type=jnp.float32) + b2_ref[...]
  o_ref[...] = out.astype(o_ref.dtype)


def transformer_block_pallas(x, mask, params, *, heads, rel_window, q_tile=None):
  B, S, D = x.shape
  DH = D // heads
  R = 2 * rel_window + 1
  if q_tile is None:
    q_tile = S
    for cand in (512, 256, 128, 64, 32, 16, 8):   # larger tiles amortize per-step overhead
      if cand <= S and S % cand == 0:
        q_tile = cand
        break
  assert S % q_tile == 0, "sequence length must be a multiple of the query tile"
  TQ = q_tile
  inv_norm = 1.0 / math.sqrt(D / heads)
  f32, bf16 = jnp.float32, jnp.bfloat16

  # --- rearrange torch-convention (out, in) params into MXU-friendly layouts ---
  w_t = params['w_qkv'].T.reshape(D, heads, 3, DH)    # columns grouped (head, q/k/v, dh)
  b_t = params['b_qkv'].reshape(heads, 3, DH)
  # inv_norm folded into the Q projection (content scores); w_rel compensated below.
  wq = (w_t[:, :, 0, :].reshape(D, D) * inv_norm).astype(bf16)        # (D, D)
  bq = b_t[:, 0, :].reshape(1, D) * inv_norm                          # (1, D) f32
  wk = w_t[:, :, 1, :].reshape(D, D)
  wv = w_t[:, :, 2, :].reshape(D, D)
  bk = b_t[:, 1, :].reshape(1, D)
  bv = b_t[:, 2, :].reshape(1, D)
  wkv = jnp.concatenate([wk, wv], axis=1).astype(bf16)                # (D, 2D)
  bkv = jnp.concatenate([bk, bv], axis=1)                             # (1, 2D) f32

  # shared rel_proj weight; scaled by sqrt(D/heads) so (q * inv_norm) @ wrelT == q @ w_rel.T
  wrelT = (params['w_rel'].T * math.sqrt(D / heads)).astype(bf16)     # (DH, R)
  brel = params['b_rel'].reshape(1, R)                                # (1, R) f32

  w1 = params['w1'].T.astype(bf16)
  b1 = params['b1'].reshape(1, 4 * D)
  w2 = params['w2'].T.astype(bf16)
  b2 = params['b2'].reshape(1, D)
  ln1_g = params['ln1_g'].reshape(1, D)
  ln1_b = params['ln1_b'].reshape(1, D)
  ln2_g = params['ln2_g'].reshape(1, D)
  ln2_b = params['ln2_b'].reshape(1, D)
  mask_f = mask.astype(f32).reshape(B, 1, S)

  def rep(a):   # fully replicated operand: same block every grid step (no re-DMA)
    nd = a.ndim
    return pl.BlockSpec(a.shape, lambda b, q, _n=nd: (0,) * _n)

  operands = (x, mask_f, ln1_g, ln1_b, wq, bq, wkv, bkv, wrelT, brel,
              ln2_g, ln2_b, w1, b1, w2, b2)
  in_specs = [
      # full-sequence x per batch element; block index constant across the query-tile axis,
      # so it is DMA'd once per batch element and the query tile is sliced in-kernel.
      pl.BlockSpec((None, S, D), lambda b, q: (b, 0, 0)),
      pl.BlockSpec((None, 1, S), lambda b, q: (b, 0, 0)),    # key mask
  ] + [rep(a) for a in operands[2:]]

  # generation-dependent VMEM budget (never request the full physical capacity, esp. v7x)
  vmem_limit = None
  try:
    cap = getattr(pltpu.get_tpu_info(), "vmem_capacity_bytes", None)
    if cap:
      vmem_limit = min(int(cap * 0.8), 112 * 1024 * 1024)
  except Exception:
    pass
  cp_kwargs = dict(
      # K/V scratch is carried across query tiles -> that axis must be "arbitrary";
      # the batch axis provides megacore parallelism.
      dimension_semantics=("parallel", "arbitrary"))
  if vmem_limit is not None:
    cp_kwargs["vmem_limit_bytes"] = vmem_limit
  # TODO(synk): on v7x with B==1, add a parallel head-group / query-chunk axis so both
  # TensorCores are used; left as-is since the toy batch already parallelizes.

  kernel = partial(_transformer_block_kernel, heads=heads, dh=DH,
                   rel_size=R, rel_window=rel_window)
  return pl.pallas_call(
      kernel,
      grid=(B, S // TQ),
      in_specs=in_specs,
      out_specs=pl.BlockSpec((None, TQ, D), lambda b, q: (b, q, 0)),
      out_shape=jax.ShapeDtypeStruct((B, S, D), jnp.float32),
      scratch_shapes=[pltpu.VMEM((S, D), jnp.bfloat16),    # K, lane-dense
                      pltpu.VMEM((S, D), jnp.bfloat16),    # V, lane-dense
                      pltpu.VMEM((TQ, D), jnp.float32)],   # per-tile attention output
      compiler_params=pltpu.CompilerParams(**cp_kwargs),
  )(*operands)


def init_params(key, dim, heads, rel_window):
  dh = dim // heads
  r = 2 * rel_window + 1
  ks = jax.random.split(key, 8)
  n = lambda k, shape, scale: jax.random.normal(k, shape, jnp.float32) * scale
  return {
      'ln1_g': jnp.ones((dim,), jnp.float32),
      'ln1_b': jnp.zeros((dim,), jnp.float32),
      'w_qkv': n(ks[0], (3 * dim, dim), 0.1),
      'b_qkv': n(ks[1], (3 * dim,), 0.02),
      'w_rel': n(ks[2], (r, dh), 0.1),        # rel_proj = nn.Linear(dim//heads, 2*W+1)
      'b_rel': n(ks[3], (r,), 0.02),
      'ln2_g': jnp.ones((dim,), jnp.float32),
      'ln2_b': jnp.zeros((dim,), jnp.float32),
      'w1': n(ks[4], (4 * dim, dim), 0.1),
      'b1': n(ks[5], (4 * dim,), 0.02),
      'w2': n(ks[6], (dim, 4 * dim), 0.1),
      'b2': n(ks[7], (dim,), 0.02),
  }


def reference(x, mask, p, *, heads, rel_window):
  """Pure-JAX mirror of the PyTorch forward (for correctness check)."""
  B, S, D = x.shape
  DH = D // heads

  def ln(v, g, b):
    mu = v.mean(-1, keepdims=True)
    var = ((v - mu) ** 2).mean(-1, keepdims=True)
    return (v - mu) / jnp.sqrt(var + 1e-6) * g + b

  xn = ln(x, p['ln1_g'], p['ln1_b'])
  qkv = (xn @ p['w_qkv'].T + p['b_qkv']).reshape(B, S, heads, 3 * DH)
  q, k, v = qkv[..., :DH], qkv[..., DH:2 * DH], qkv[..., 2 * DH:]
  q, k, v = (t.transpose(0, 2, 1, 3) for t in (q, k, v))
  idx = jnp.arange(S)
  offs = jnp.clip(idx[None, :] - idx[:, None], -rel_window, rel_window) + rel_window
  content = jnp.einsum('bhik,bhjk->bhij', q, k) / math.sqrt(D / heads)
  relp = q @ p['w_rel'].T + p['b_rel']
  position = jnp.take_along_axis(relp, jnp.broadcast_to(offs, (B, heads, S, S)), axis=-1)
  scores = content + position
  scores = jnp.where(mask[:, None, None, :], scores, -1e30)
  attn = jax.nn.softmax(scores, axis=-1)
  ret = jnp.einsum('bhij,bhjk->bhik', attn, v)
  x = x + ret.transpose(0, 2, 1, 3).reshape(B, S, D)
  x1n = ln(x, p['ln2_g'], p['ln2_b'])
  h = x1n @ p['w1'].T + p['b1']
  h = 0.5 * h * (1.0 + jax.lax.erf(h / jnp.sqrt(2.0)))
  return x + h @ p['w2'].T + p['b2']


if __name__ == "__main__":
  B, S, D, H, W = 2, 16, 32, 4, 3
  key = jax.random.PRNGKey(0)
  kx, kp = jax.random.split(key)
  x = jax.random.normal(kx, (B, S, D), jnp.float32)
  mask = jnp.ones((B, S), dtype=bool).at[1, S - 3:].set(False)
  params = init_params(kp, D, H, W)

  # q_tile=8 -> 2 query tiles per batch element, exercising the tiled grid + K/V scratch carry
  out = transformer_block_pallas(x, mask, params, heads=H, rel_window=W, q_tile=8)
  out = jax.block_until_ready(out)

  ref = reference(x, mask, params, heads=H, rel_window=W)
  err = float(jnp.max(jnp.abs(out - ref)))
  # tolerance accounts for bf16 MXU inputs (f32 accumulation) vs the pure-f32 reference
  assert jnp.allclose(out, ref, atol=4e-2, rtol=4e-2), f"max abs err {err}"
  print("KERNEL_OK")
</pallas_src>

<mosaic_0001>
module attributes {stable_mosaic.version = 11 : i64} {
  func.func @_transformer_block_kernel(%arg0: i32, %arg1: i32, %arg2: memref<1x16x32xf32, #tpu.memory_space<vmem>>, %arg3: memref<1x1x16xf32, #tpu.memory_space<vmem>>, %arg4: memref<1x32xf32, #tpu.memory_space<vmem>>, %arg5: memref<1x32xf32, #tpu.memory_space<vmem>>, %arg6: memref<32x32xbf16, #tpu.memory_space<vmem>>, %arg7: memref<1x32xf32, #tpu.memory_space<vmem>>, %arg8: memref<32x64xbf16, #tpu.memory_space<vmem>>, %arg9: memref<1x64xf32, #tpu.memory_space<vmem>>, %arg10: memref<8x7xbf16, #tpu.memory_space<vmem>>, %arg11: memref<1x7xf32, #tpu.memory_space<vmem>>, %arg12: memref<1x32xf32, #tpu.memory_space<vmem>>, %arg13: memref<1x32xf32, #tpu.memory_space<vmem>>, %arg14: memref<32x128xbf16, #tpu.memory_space<vmem>>, %arg15: memref<1x128xf32, #tpu.memory_space<vmem>>, %arg16: memref<128x32xbf16, #tpu.memory_space<vmem>>, %arg17: memref<1x32xf32, #tpu.memory_space<vmem>>, %arg18: memref<1x8x32xf32, #tpu.memory_space<vmem>>, %arg19: memref<16x32xbf16, #tpu.memory_space<vmem>>, %arg20: memref<16x32xbf16, #tpu.memory_space<vmem>>, %arg21: memref<8x32xf32, #tpu.memory_space<vmem>>) attributes {dimension_semantics = [#tpu.dimension_semantics<parallel>, #tpu.dimension_semantics<arbitrary>], iteration_bounds = array<i64: 2, 2>, scalar_prefetch = 0 : i64, scratch_operands = 3 : i64, tpu.core_type = #tpu.core_type<tc>, window_params = [{transform_indices = @transform_0, window_bounds = array<i64: 1, 16, 32>}, {transform_indices = @transform_1, window_bounds = array<i64: 1, 1, 16>}, {pipeline_mode = #tpu.pipeline_mode<synchronous>, transform_indices = @transform_2, window_bounds = array<i64: 1, 32>}, {pipeline_mode = #tpu.pipeline_mode<synchronous>, transform_indices = @transform_3, window_bounds = array<i64: 1, 32>}, {pipeline_mode = #tpu.pipeline_mode<synchronous>, transform_indices = @transform_4, window_bounds = array<i64: 32, 32>}, {pipeline_mode = #tpu.pipeline_mode<synchronous>, transform_indices = @transform_5, window_bounds = array<i64: 1, 32>}, {pipeline_mode = #tpu.pipeline_mode<synchronous>, transform_indices = @transform_6, window_bounds = array<i64: 32, 64>}, {pipeline_mode = #tpu.pipeline_mode<synchronous>, transform_indices = @transform_7, window_bounds = array<i64: 1, 64>}, {pipeline_mode = #tpu.pipeline_mode<synchronous>, transform_indices = @transform_8, window_bounds = array<i64: 8, 7>}, {pipeline_mode = #tpu.pipeline_mode<synchronous>, transform_indices = @transform_9, window_bounds = array<i64: 1, 7>}, {pipeline_mode = #tpu.pipeline_mode<synchronous>, transform_indices = @transform_10, window_bounds = array<i64: 1, 32>}, {pipeline_mode = #tpu.pipeline_mode<synchronous>, transform_indices = @transform_11, window_bounds = array<i64: 1, 32>}, {pipeline_mode = #tpu.pipeline_mode<synchronous>, transform_indices = @transform_12, window_bounds = array<i64: 32, 128>}, {pipeline_mode = #tpu.pipeline_mode<synchronous>, transform_indices = @transform_13, window_bounds = array<i64: 1, 128>}, {pipeline_mode = #tpu.pipeline_mode<synchronous>, transform_indices = @transform_14, window_bounds = array<i64: 128, 32>}, {pipeline_mode = #tpu.pipeline_mode<synchronous>, transform_indices = @transform_15, window_bounds = array<i64: 1, 32>}, {transform_indices = @transform_16, window_bounds = array<i64: 1, 8, 32>}]} {
    %c0 = arith.constant 0 : index
    %c0_0 = arith.constant 0 : index
    %0 = vector.load %arg4[%c0, %c0_0] : memref<1x32xf32, #tpu.memory_space<vmem>>, vector<1x32xf32>
    %c0_1 = arith.constant 0 : index
    %c0_2 = arith.constant 0 : index
    %1 = vector.load %arg5[%c0_1, %c0_2] : memref<1x32xf32, #tpu.memory_space<vmem>>, vector<1x32xf32>
    %c0_i32 = arith.constant 0 : i32
    %2 = arith.cmpi eq, %arg1, %c0_i32 : i32
    %3 = arith.extui %2 : i1 to i32
    %c0_i32_3 = arith.constant 0 : i32
    %4 = arith.cmpi ne, %3, %c0_i32_3 : i32
    scf.if %4 {
      %c0_143 = arith.constant 0 : index
      %c0_144 = arith.constant 0 : index
      %c0_145 = arith.constant 0 : index
      %413 = vector.load %arg2[%c0_143, %c0_144, %c0_145] : memref<1x16x32xf32, #tpu.memory_space<vmem>>, vector<1x16x32xf32>
      %414 = vector.shape_cast %413 : vector<1x16x32xf32> to vector<16x32xf32>
      %cst_146 = arith.constant dense<0.000000e+00> : vector<16xf32>
      %415 = vector.multi_reduction <add>, %414, %cst_146 [1] : vector<16x32xf32> to vector<16xf32>
      %416 = vector.shape_cast %415 : vector<16xf32> to vector<16x1xf32>
      %cst_147 = arith.constant 3.200000e+01 : f32
      %417 = vector.broadcast %cst_147 : f32 to vector<16x1xf32>
      %418 = arith.divf %416, %417 : vector<16x1xf32>
      %419 = vector.broadcast %418 : vector<16x1xf32> to vector<16x32xf32>
      %420 = arith.subf %414, %419 : vector<16x32xf32>
      %421 = arith.mulf %420, %420 : vector<16x32xf32>
      %cst_148 = arith.constant dense<0.000000e+00> : vector<16xf32>
      %422 = vector.multi_reduction <add>, %421, %cst_148 [1] : vector<16x32xf32> to vector<16xf32>
      %423 = vector.shape_cast %422 : vector<16xf32> to vector<16x1xf32>
      %cst_149 = arith.constant 3.200000e+01 : f32
      %424 = vector.broadcast %cst_149 : f32 to vector<16x1xf32>
      %425 = arith.divf %423, %424 : vector<16x1xf32>
      %426 = vector.broadcast %418 : vector<16x1xf32> to vector<16x32xf32>
      %427 = arith.subf %414, %426 : vector<16x32xf32>
      %cst_150 = arith.constant 9.99999997E-7 : f32
      %428 = vector.broadcast %cst_150 : f32 to vector<16x1xf32>
      %429 = arith.addf %425, %428 : vector<16x1xf32>
      %430 = math.rsqrt %429 : vector<16x1xf32>
      %431 = vector.broadcast %430 : vector<16x1xf32> to vector<16x32xf32>
      %432 = arith.mulf %427, %431 : vector<16x32xf32>
      %433 = vector.broadcast %0 : vector<1x32xf32> to vector<16x32xf32>
      %434 = arith.mulf %432, %433 : vector<16x32xf32>
      %435 = vector.broadcast %1 : vector<1x32xf32> to vector<16x32xf32>
      %436 = arith.addf %434, %435 : vector<16x32xf32>
      %437 = arith.truncf %436 : vector<16x32xf32> to vector<16x32xbf16>
      %c0_151 = arith.constant 0 : index
      %c0_152 = arith.constant 0 : index
      %438 = vector.load %arg8[%c0_151, %c0_152] : memref<32x64xbf16, #tpu.memory_space<vmem>>, vector<32x64xbf16>
      %cst_153 = arith.constant dense<0.000000e+00> : vector<16x64xf32>
      %439 = tpu.matmul %437, %438, %cst_153 {dimension_numbers = #tpu.dot_dimension_numbers<[1], [0], [0], [1], [0, 0, 1, 1], [], []>} : vector<16x32xbf16>, vector<32x64xbf16>, vector<16x64xf32> -> vector<16x64xf32>
      %c0_154 = arith.constant 0 : index
      %c0_155 = arith.constant 0 : index
      %440 = vector.load %arg9[%c0_154, %c0_155] : memref<1x64xf32, #tpu.memory_space<vmem>>, vector<1x64xf32>
      %441 = vector.broadcast %440 : vector<1x64xf32> to vector<16x64xf32>
      %442 = arith.addf %439, %441 : vector<16x64xf32>
      %443 = vector.extract_strided_slice %442 {offsets = [0, 0], sizes = [16, 32], strides = [1, 1]} : vector<16x64xf32> to vector<16x32xf32>
      %444 = arith.truncf %443 : vector<16x32xf32> to vector<16x32xbf16>
      %c0_156 = arith.constant 0 : index
      %c0_157 = arith.constant 0 : index
      %445 = vector.load %arg19[%c0_156, %c0_157] : memref<16x32xbf16, #tpu.memory_space<vmem>>, vector<16x32xbf16>
      tpu.vector_store %arg19[%c0_156, %c0_157], %444 {strides = array<i32>} : memref<16x32xbf16, #tpu.memory_space<vmem>>, vector<16x32xbf16>,
      %446 = vector.extract_strided_slice %442 {offsets = [0, 32], sizes = [16, 32], strides = [1, 1]} : vector<16x64xf32> to vector<16x32xf32>
      %447 = arith.truncf %446 : vector<16x32xf32> to vector<16x32xbf16>
      %c0_158 = arith.constant 0 : index
      %c0_159 = arith.constant 0 : index
      %448 = vector.load %arg20[%c0_158, %c0_159] : memref<16x32xbf16, #tpu.memory_space<vmem>>, vector<16x32xbf16>
      tpu.vector_store %arg20[%c0_158, %c0_159], %447 {strides = array<i32>} : memref<16x32xbf16, #tpu.memory_space<vmem>>, vector<16x32xbf16>,
    } else {
    }
    %c8_i32 = arith.constant 8 : i32
    %5 = arith.muli %arg1, %c8_i32 : i32
    %6 = tpu.assume_multiple %5, 8 : i32
    %c0_4 = arith.constant 0 : index
    %7 = arith.index_cast %6 : i32 to index
    %c0_5 = arith.constant 0 : index
    %8 = vector.load %arg2[%c0_4, %7, %c0_5] : memref<1x16x32xf32, #tpu.memory_space<vmem>>, vector<1x8x32xf32>
    %9 = vector.shape_cast %8 : vector<1x8x32xf32> to vector<8x32xf32>
    %cst = arith.constant dense<0.000000e+00> : vector<8xf32>
    %10 = vector.multi_reduction <add>, %9, %cst [1] : vector<8x32xf32> to vector<8xf32>
    %11 = vector.shape_cast %10 : vector<8xf32> to vector<8x1xf32>
    %cst_6 = arith.constant 3.200000e+01 : f32
    %12 = vector.broadcast %cst_6 : f32 to vector<8x1xf32>
    %13 = arith.divf %11, %12 : vector<8x1xf32>
    %14 = vector.broadcast %13 : vector<8x1xf32> to vector<8x32xf32>
    %15 = arith.subf %9, %14 : vector<8x32xf32>
    %16 = arith.mulf %15, %15 : vector<8x32xf32>
    %cst_7 = arith.constant dense<0.000000e+00> : vector<8xf32>
    %17 = vector.multi_reduction <add>, %16, %cst_7 [1] : vector<8x32xf32> to vector<8xf32>
    %18 = vector.shape_cast %17 : vector<8xf32> to vector<8x1xf32>
    %cst_8 = arith.constant 3.200000e+01 : f32
    %19 = vector.broadcast %cst_8 : f32 to vector<8x1xf32>
    %20 = arith.divf %18, %19 : vector<8x1xf32>
    %21 = vector.broadcast %13 : vector<8x1xf32> to vector<8x32xf32>
    %22 = arith.subf %9, %21 : vector<8x32xf32>
    %cst_9 = arith.constant 9.99999997E-7 : f32
    %23 = vector.broadcast %cst_9 : f32 to vector<8x1xf32>
    %24 = arith.addf %20, %23 : vector<8x1xf32>
    %25 = math.rsqrt %24 : vector<8x1xf32>
    %26 = vector.broadcast %25 : vector<8x1xf32> to vector<8x32xf32>
    %27 = arith.mulf %22, %26 : vector<8x32xf32>
    %28 = vector.broadcast %0 : vector<1x32xf32> to vector<8x32xf32>
    %29 = arith.mulf %27, %28 : vector<8x32xf32>
    %30 = vector.broadcast %1 : vector<1x32xf32> to vector<8x32xf32>
    %31 = arith.addf %29, %30 : vector<8x32xf32>
    %32 = arith.truncf %31 : vector<8x32xf32> to vector<8x32xbf16>
    %c0_10 = arith.constant 0 : index
    %c0_11 = arith.constant 0 : index
    %33 = vector.load %arg6[%c0_10, %c0_11] : memref<32x32xbf16, #tpu.memory_space<vmem>>, vector<32x32xbf16>
    %cst_12 = arith.constant dense<0.000000e+00> : vector<8x32xf32>
    %34 = tpu.matmul %32, %33, %cst_12 {dimension_numbers = #tpu.dot_dimension_numbers<[1], [0], [0], [1], [0, 0, 1, 1], [], []>} : vector<8x32xbf16>, vector<32x32xbf16>, vector<8x32xf32> -> vector<8x32xf32>
    %c0_13 = arith.constant 0 : index
    %c0_14 = arith.constant 0 : index
    %35 = vector.load %arg7[%c0_13, %c0_14] : memref<1x32xf32, #tpu.memory_space<vmem>>, vector<1x32xf32>
    %36 = vector.broadcast %35 : vector<1x32xf32> to vector<8x32xf32>
    %37 = arith.addf %34, %36 : vector<8x32xf32>
    %38 = arith.truncf %37 : vector<8x32xf32> to vector<8x32xbf16>
    %39 = tpu.iota {dimensions = array<i32: 0>} : vector<8x16xi32>
    %40 = vector.broadcast %6 : i32 to vector<8x16xi32>
    %41 = arith.addi %39, %40 : vector<8x16xi32>
    %42 = tpu.iota {dimensions = array<i32: 1>} : vector<8x16xi32>
    %43 = arith.subi %42, %41 : vector<8x16xi32>
    %c0_15 = arith.constant 0 : index
    %c0_16 = arith.constant 0 : index
    %c0_17 = arith.constant 0 : index
    %44 = vector.load %arg3[%c0_15, %c0_16, %c0_17] : memref<1x1x16xf32, #tpu.memory_space<vmem>>, vector<1x1x16xf32>
    %45 = vector.shape_cast %44 : vector<1x1x16xf32> to vector<1x16xf32>
    %cst_18 = arith.constant 5.000000e-01 : f32
    %46 = vector.broadcast %cst_18 : f32 to vector<1x16xf32>
    %47 = arith.cmpf ogt, %45, %46 : vector<1x16xf32>
    %cst_19 = arith.constant 0.000000e+00 : f32
    %cst_20 = arith.constant -1.000000e+30 : f32
    %48 = vector.broadcast %cst_19 : f32 to vector<1x16xf32>
    %49 = vector.broadcast %cst_20 : f32 to vector<1x16xf32>
    %50 = arith.select %47, %48, %49 : vector<1x16xi1>, vector<1x16xf32>
    %51 = vector.shape_cast %50 : vector<1x16xf32> to vector<1x16xf32>
    %52 = vector.broadcast %51 : vector<1x16xf32> to vector<8x16xf32>
    %c0_21 = arith.constant 0 : index
    %c0_22 = arith.constant 0 : index
    %53 = vector.load %arg10[%c0_21, %c0_22] : memref<8x7xbf16, #tpu.memory_space<vmem>>, vector<8x7xbf16>
    %c0_23 = arith.constant 0 : index
    %c0_24 = arith.constant 0 : index
    %54 = vector.load %arg11[%c0_23, %c0_24] : memref<1x7xf32, #tpu.memory_space<vmem>>, vector<1x7xf32>
    %55 = vector.extract_strided_slice %38 {offsets = [0, 0], sizes = [8, 8], strides = [1, 1]} : vector<8x32xbf16> to vector<8x8xbf16>
    %c0_25 = arith.constant 0 : index
    %c0_26 = arith.constant 0 : index
    %56 = vector.load %arg19[%c0_25, %c0_26] : memref<16x32xbf16, #tpu.memory_space<vmem>>, vector<16x8xbf16>
    %c0_27 = arith.constant 0 : index
    %c0_28 = arith.constant 0 : index
    %57 = vector.load %arg20[%c0_27, %c0_28] : memref<16x32xbf16, #tpu.memory_space<vmem>>, vector<16x8xbf16>
    %cst_29 = arith.constant dense<0.000000e+00> : vector<8x16xf32>
    %58 = tpu.matmul %55, %56, %cst_29 {dimension_numbers = #tpu.dot_dimension_numbers<[1], [1], [0], [0], [0, 0, 1, 0], [], []>} : vector<8x8xbf16>, vector<16x8xbf16>, vector<8x16xf32> -> vector<8x16xf32>
    %cst_30 = arith.constant dense<0.000000e+00> : vector<8x7xf32>
    %59 = tpu.matmul %55, %53, %cst_30 {dimension_numbers = #tpu.dot_dimension_numbers<[1], [0], [0], [1], [0, 0, 1, 1], [], []>} : vector<8x8xbf16>, vector<8x7xbf16>, vector<8x7xf32> -> vector<8x7xf32>
    %60 = vector.broadcast %54 : vector<1x7xf32> to vector<8x7xf32>
    %61 = arith.addf %59, %60 : vector<8x7xf32>
    %c-3_i32 = arith.constant -3 : i32
    %62 = vector.broadcast %c-3_i32 : i32 to vector<8x16xi32>
    %63 = arith.cmpi sle, %43, %62 : vector<8x16xi32>
    %64 = vector.extract_strided_slice %61 {offsets = [0, 0], sizes = [8, 1], strides = [1, 1]} : vector<8x7xf32> to vector<8x1xf32>
    %cst_31 = arith.constant 0.000000e+00 : f32
    %65 = vector.shape_cast %64 : vector<8x1xf32> to vector<8x1xf32>
    %66 = vector.broadcast %65 : vector<8x1xf32> to vector<8x16xf32>
    %67 = vector.broadcast %cst_31 : f32 to vector<8x16xf32>
    %68 = arith.select %63, %66, %67 : vector<8x16xi1>, vector<8x16xf32>
    %c3_i32 = arith.constant 3 : i32
    %69 = vector.broadcast %c3_i32 : i32 to vector<8x16xi32>
    %70 = arith.cmpi sge, %43, %69 : vector<8x16xi32>
    %71 = vector.extract_strided_slice %61 {offsets = [0, 6], sizes = [8, 1], strides = [1, 1]} : vector<8x7xf32> to vector<8x1xf32>
    %cst_32 = arith.constant 0.000000e+00 : f32
    %72 = vector.shape_cast %71 : vector<8x1xf32> to vector<8x1xf32>
    %73 = vector.broadcast %72 : vector<8x1xf32> to vector<8x16xf32>
    %74 = vector.broadcast %cst_32 : f32 to vector<8x16xf32>
    %75 = arith.select %70, %73, %74 : vector<8x16xi1>, vector<8x16xf32>
    %76 = arith.addf %68, %75 : vector<8x16xf32>
    %c-2_i32 = arith.constant -2 : i32
    %77 = vector.broadcast %c-2_i32 : i32 to vector<8x16xi32>
    %78 = arith.cmpi eq, %43, %77 : vector<8x16xi32>
    %79 = vector.extract_strided_slice %61 {offsets = [0, 1], sizes = [8, 1], strides = [1, 1]} : vector<8x7xf32> to vector<8x1xf32>
    %cst_33 = arith.constant 0.000000e+00 : f32
    %80 = vector.shape_cast %79 : vector<8x1xf32> to vector<8x1xf32>
    %81 = vector.broadcast %80 : vector<8x1xf32> to vector<8x16xf32>
    %82 = vector.broadcast %cst_33 : f32 to vector<8x16xf32>
    %83 = arith.select %78, %81, %82 : vector<8x16xi1>, vector<8x16xf32>
    %84 = arith.addf %76, %83 : vector<8x16xf32>
    %c-1_i32 = arith.constant -1 : i32
    %85 = vector.broadcast %c-1_i32 : i32 to vector<8x16xi32>
    %86 = arith.cmpi eq, %43, %85 : vector<8x16xi32>
    %87 = vector.extract_strided_slice %61 {offsets = [0, 2], sizes = [8, 1], strides = [1, 1]} : vector<8x7xf32> to vector<8x1xf32>
    %cst_34 = arith.constant 0.000000e+00 : f32
    %88 = vector.shape_cast %87 : vector<8x1xf32> to vector<8x1xf32>
    %89 = vector.broadcast %88 : vector<8x1xf32> to vector<8x16xf32>
    %90 = vector.broadcast %cst_34 : f32 to vector<8x16xf32>
    %91 = arith.select %86, %89, %90 : vector<8x16xi1>, vector<8x16xf32>
    %92 = arith.addf %84, %91 : vector<8x16xf32>
    %c0_i32_35 = arith.constant 0 : i32
    %93 = vector.broadcast %c0_i32_35 : i32 to vector<8x16xi32>
    %94 = arith.cmpi eq, %43, %93 : vector<8x16xi32>
    %95 = vector.extract_strided_slice %61 {offsets = [0, 3], sizes = [8, 1], strides = [1, 1]} : vector<8x7xf32> to vector<8x1xf32>
    %cst_36 = arith.constant 0.000000e+00 : f32
    %96 = vector.shape_cast %95 : vector<8x1xf32> to vector<8x1xf32>
    %97 = vector.broadcast %96 : vector<8x1xf32> to vector<8x16xf32>
    %98 = vector.broadcast %cst_36 : f32 to vector<8x16xf32>
    %99 = arith.select %94, %97, %98 : vector<8x16xi1>, vector<8x16xf32>
    %100 = arith.addf %92, %99 : vector<8x16xf32>
    %c1_i32 = arith.constant 1 : i32
    %101 = vector.broadcast %c1_i32 : i32 to vector<8x16xi32>
    %102 = arith.cmpi eq, %43, %101 : vector<8x16xi32>
    %103 = vector.extract_strided_slice %61 {offsets = [0, 4], sizes = [8, 1], strides = [1, 1]} : vector<8x7xf32> to vector<8x1xf32>
    %cst_37 = arith.constant 0.000000e+00 : f32
    %104 = vector.shape_cast %103 : vector<8x1xf32> to vector<8x1xf32>
    %105 = vector.broadcast %104 : vector<8x1xf32> to vector<8x16xf32>
    %106 = vector.broadcast %cst_37 : f32 to vector<8x16xf32>
    %107 = arith.select %102, %105, %106 : vector<8x16xi1>, vector<8x16xf32>
    %108 = arith.addf %100, %107 : vector<8x16xf32>
    %c2_i32 = arith.constant 2 : i32
    %109 = vector.broadcast %c2_i32 : i32 to vector<8x16xi32>
    %110 = arith.cmpi eq, %43, %109 : vector<8x16xi32>
    %111 = vector.extract_strided_slice %61 {offsets = [0, 5], sizes = [8, 1], strides = [1, 1]} : vector<8x7xf32> to vector<8x1xf32>
    %cst_38 = arith.constant 0.000000e+00 : f32
    %112 = vector.shape_cast %111 : vector<8x1xf32> to vector<8x1xf32>
    %113 = vector.broadcast %112 : vector<8x1xf32> to vector<8x16xf32>
    %114 = vector.broadcast %cst_38 : f32 to vector<8x16xf32>
    %115 = arith.select %110, %113, %114 : vector<8x16xi1>, vector<8x16xf32>
    %116 = arith.addf %108, %115 : vector<8x16xf32>
    %117 = arith.addf %58, %116 : vector<8x16xf32>
    %118 = arith.addf %117, %52 : vector<8x16xf32>
    %cst_39 = arith.constant dense<0xFF800000> : vector<8xf32>
    %119 = vector.multi_reduction <maximumf>, %118, %cst_39 [1] : vector<8x16xf32> to vector<8xf32>
    %120 = vector.shape_cast %119 : vector<8xf32> to vector<8x1xf32>
    %121 = vector.broadcast %120 : vector<8x1xf32> to vector<8x16xf32>
    %122 = arith.subf %118, %121 : vector<8x16xf32>
    %123 = math.exp %122 : vector<8x16xf32>
    %cst_40 = arith.constant dense<0.000000e+00> : vector<8xf32>
    %124 = vector.multi_reduction <add>, %123, %cst_40 [1] : vector<8x16xf32> to vector<8xf32>
    %125 = vector.shape_cast %124 : vector<8xf32> to vector<8x1xf32>
    %126 = tpu.reciprocal %125 {approx = true} : vector<8x1xf32> -> vector<8x1xf32>
    %127 = vector.broadcast %126 : vector<8x1xf32> to vector<8x16xf32>
    %128 = arith.mulf %123, %127 : vector<8x16xf32>
    %129 = arith.truncf %128 : vector<8x16xf32> to vector<8x16xbf16>
    %cst_41 = arith.constant dense<0.000000e+00> : vector<8x8xf32>
    %130 = tpu.matmul %129, %57, %cst_41 {dimension_numbers = #tpu.dot_dimension_numbers<[1], [0], [0], [1], [0, 0, 1, 1], [], []>} : vector<8x16xbf16>, vector<16x8xbf16>, vector<8x8xf32> -> vector<8x8xf32>
    %c0_42 = arith.constant 0 : index
    %c0_43 = arith.constant 0 : index
    %131 = vector.load %arg21[%c0_42, %c0_43] : memref<8x32xf32, #tpu.memory_space<vmem>>, vector<8x8xf32>
    tpu.vector_store %arg21[%c0_42, %c0_43], %130 {strides = array<i32>} : memref<8x32xf32, #tpu.memory_space<vmem>>, vector<8x8xf32>,
    %132 = vector.extract_strided_slice %38 {offsets = [0, 8], sizes = [8, 8], strides = [1, 1]} : vector<8x32xbf16> to vector<8x8xbf16>
    %c0_44 = arith.constant 0 : index
    %c8 = arith.constant 8 : index
    %133 = vector.load %arg19[%c0_44, %c8] : memref<16x32xbf16, #tpu.memory_space<vmem>>, vector<16x8xbf16>
    %c0_45 = arith.constant 0 : index
    %c8_46 = arith.constant 8 : index
    %134 = vector.load %arg20[%c0_45, %c8_46] : memref<16x32xbf16, #tpu.memory_space<vmem>>, vector<16x8xbf16>
    %cst_47 = arith.constant dense<0.000000e+00> : vector<8x16xf32>
    %135 = tpu.matmul %132, %133, %cst_47 {dimension_numbers = #tpu.dot_dimension_numbers<[1], [1], [0], [0], [0, 0, 1, 0], [], []>} : vector<8x8xbf16>, vector<16x8xbf16>, vector<8x16xf32> -> vector<8x16xf32>
    %cst_48 = arith.constant dense<0.000000e+00> : vector<8x7xf32>
    %136 = tpu.matmul %132, %53, %cst_48 {dimension_numbers = #tpu.dot_dimension_numbers<[1], [0], [0], [1], [0, 0, 1, 1], [], []>} : vector<8x8xbf16>, vector<8x7xbf16>, vector<8x7xf32> -> vector<8x7xf32>
    %137 = vector.broadcast %54 : vector<1x7xf32> to vector<8x7xf32>
    %138 = arith.addf %136, %137 : vector<8x7xf32>
    %c-3_i32_49 = arith.constant -3 : i32
    %139 = vector.broadcast %c-3_i32_49 : i32 to vector<8x16xi32>
    %140 = arith.cmpi sle, %43, %139 : vector<8x16xi32>
    %141 = vector.extract_strided_slice %138 {offsets = [0, 0], sizes = [8, 1], strides = [1, 1]} : vector<8x7xf32> to vector<8x1xf32>
    %cst_50 = arith.constant 0.000000e+00 : f32
    %142 = vector.shape_cast %141 : vector<8x1xf32> to vector<8x1xf32>
    %143 = vector.broadcast %142 : vector<8x1xf32> to vector<8x16xf32>
    %144 = vector.broadcast %cst_50 : f32 to vector<8x16xf32>
    %145 = arith.select %140, %143, %144 : vector<8x16xi1>, vector<8x16xf32>
    %c3_i32_51 = arith.constant 3 : i32
    %146 = vector.broadcast %c3_i32_51 : i32 to vector<8x16xi32>
    %147 = arith.cmpi sge, %43, %146 : vector<8x16xi32>
    %148 = vector.extract_strided_slice %138 {offsets = [0, 6], sizes = [8, 1], strides = [1, 1]} : vector<8x7xf32> to vector<8x1xf32>
    %cst_52 = arith.constant 0.000000e+00 : f32
    %149 = vector.shape_cast %148 : vector<8x1xf32> to vector<8x1xf32>
    %150 = vector.broadcast %149 : vector<8x1xf32> to vector<8x16xf32>
    %151 = vector.broadcast %cst_52 : f32 to vector<8x16xf32>
    %152 = arith.select %147, %150, %151 : vector<8x16xi1>, vector<8x16xf32>
    %153 = arith.addf %145, %152 : vector<8x16xf32>
    %c-2_i32_53 = arith.constant -2 : i32
    %154 = vector.broadcast %c-2_i32_53 : i32 to vector<8x16xi32>
    %155 = arith.cmpi eq, %43, %154 : vector<8x16xi32>
    %156 = vector.extract_strided_slice %138 {offsets = [0, 1], sizes = [8, 1], strides = [1, 1]} : vector<8x7xf32> to vector<8x1xf32>
    %cst_54 = arith.constant 0.000000e+00 : f32
    %157 = vector.shape_cast %156 : vector<8x1xf32> to vector<8x1xf32>
    %158 = vector.broadcast %157 : vector<8x1xf32> to vector<8x16xf32>
    %159 = vector.broadcast %cst_54 : f32 to vector<8x16xf32>
    %160 = arith.select %155, %158, %159 : vector<8x16xi1>, vector<8x16xf32>
    %161 = arith.addf %153, %160 : vector<8x16xf32>
    %c-1_i32_55 = arith.constant -1 : i32
    %162 = vector.broadcast %c-1_i32_55 : i32 to vector<8x16xi32>
    %163 = arith.cmpi eq, %43, %162 : vector<8x16xi32>
    %164 = vector.extract_strided_slice %138 {offsets = [0, 2], sizes = [8, 1], strides = [1, 1]} : vector<8x7xf32> to vector<8x1xf32>
    %cst_56 = arith.constant 0.000000e+00 : f32
    %165 = vector.shape_cast %164 : vector<8x1xf32> to vector<8x1xf32>
    %166 = vector.broadcast %165 : vector<8x1xf32> to vector<8x16xf32>
    %167 = vector.broadcast %cst_56 : f32 to vector<8x16xf32>
    %168 = arith.select %163, %166, %167 : vector<8x16xi1>, vector<8x16xf32>
    %169 = arith.addf %161, %168 : vector<8x16xf32>
    %c0_i32_57 = arith.constant 0 : i32
    %170 = vector.broadcast %c0_i32_57 : i32 to vector<8x16xi32>
    %171 = arith.cmpi eq, %43, %170 : vector<8x16xi32>
    %172 = vector.extract_strided_slice %138 {offsets = [0, 3], sizes = [8, 1], strides = [1, 1]} : vector<8x7xf32> to vector<8x1xf32>
    %cst_58 = arith.constant 0.000000e+00 : f32
    %173 = vector.shape_cast %172 : vector<8x1xf32> to vector<8x1xf32>
    %174 = vector.broadcast %173 : vector<8x1xf32> to vector<8x16xf32>
    %175 = vector.broadcast %cst_58 : f32 to vector<8x16xf32>
    %176 = arith.select %171, %174, %175 : vector<8x16xi1>, vector<8x16xf32>
    %177 = arith.addf %169, %176 : vector<8x16xf32>
    %c1_i32_59 = arith.constant 1 : i32
    %178 = vector.broadcast %c1_i32_59 : i32 to vector<8x16xi32>
    %179 = arith.cmpi eq, %43, %178 : vector<8x16xi32>
    %180 = vector.extract_strided_slice %138 {offsets = [0, 4], sizes = [8, 1], strides = [1, 1]} : vector<8x7xf32> to vector<8x1xf32>
    %cst_60 = arith.constant 0.000000e+00 : f32
    %181 = vector.shape_cast %180 : vector<8x1xf32> to vector<8x1xf32>
    %182 = vector.broadcast %181 : vector<8x1xf32> to vector<8x16xf32>
    %183 = vector.broadcast %cst_60 : f32 to vector<8x16xf32>
    %184 = arith.select %179, %182, %183 : vector<8x16xi1>, vector<8x16xf32>
    %185 = arith.addf %177, %184 : vector<8x16xf32>
    %c2_i32_61 = arith.constant 2 : i32
    %186 = vector.broadcast %c2_i32_61 : i32 to vector<8x16xi32>
    %187 = arith.cmpi eq, %43, %186 : vector<8x16xi32>
    %188 = vector.extract_strided_slice %138 {offsets = [0, 5], sizes = [8, 1], strides = [1, 1]} : vector<8x7xf32> to vector<8x1xf32>
    %cst_62 = arith.constant 0.000000e+00 : f32
    %189 = vector.shape_cast %188 : vector<8x1xf32> to vector<8x1xf32>
    %190 = vector.broadcast %189 : vector<8x1xf32> to vector<8x16xf32>
    %191 = vector.broadcast %cst_62 : f32 to vector<8x16xf32>
    %192 = arith.select %187, %190, %191 : vector<8x16xi1>, vector<8x16xf32>
    %193 = arith.addf %185, %192 : vector<8x16xf32>
    %194 = arith.addf %135, %193 : vector<8x16xf32>
    %195 = arith.addf %194, %52 : vector<8x16xf32>
    %cst_63 = arith.constant dense<0xFF800000> : vector<8xf32>
    %196 = vector.multi_reduction <maximumf>, %195, %cst_63 [1] : vector<8x16xf32> to vector<8xf32>
    %197 = vector.shape_cast %196 : vector<8xf32> to vector<8x1xf32>
    %198 = vector.broadcast %197 : vector<8x1xf32> to vector<8x16xf32>
    %199 = arith.subf %195, %198 : vector<8x16xf32>
    %200 = math.exp %199 : vector<8x16xf32>
    %cst_64 = arith.constant dense<0.000000e+00> : vector<8xf32>
    %201 = vector.multi_reduction <add>, %200, %cst_64 [1] : vector<8x16xf32> to vector<8xf32>
    %202 = vector.shape_cast %201 : vector<8xf32> to vector<8x1xf32>
    %203 = tpu.reciprocal %202 {approx = true} : vector<8x1xf32> -> vector<8x1xf32>
    %204 = vector.broadcast %203 : vector<8x1xf32> to vector<8x16xf32>
    %205 = arith.mulf %200, %204 : vector<8x16xf32>
    %206 = arith.truncf %205 : vector<8x16xf32> to vector<8x16xbf16>
    %cst_65 = arith.constant dense<0.000000e+00> : vector<8x8xf32>
    %207 = tpu.matmul %206, %134, %cst_65 {dimension_numbers = #tpu.dot_dimension_numbers<[1], [0], [0], [1], [0, 0, 1, 1], [], []>} : vector<8x16xbf16>, vector<16x8xbf16>, vector<8x8xf32> -> vector<8x8xf32>
    %c0_66 = arith.constant 0 : index
    %c8_67 = arith.constant 8 : index
    %208 = vector.load %arg21[%c0_66, %c8_67] : memref<8x32xf32, #tpu.memory_space<vmem>>, vector<8x8xf32>
    tpu.vector_store %arg21[%c0_66, %c8_67], %207 {strides = array<i32>} : memref<8x32xf32, #tpu.memory_space<vmem>>, vector<8x8xf32>,
    %209 = vector.extract_strided_slice %38 {offsets = [0, 16], sizes = [8, 8], strides = [1, 1]} : vector<8x32xbf16> to vector<8x8xbf16>
    %c0_68 = arith.constant 0 : index
    %c16 = arith.constant 16 : index
    %210 = vector.load %arg19[%c0_68, %c16] : memref<16x32xbf16, #tpu.memory_space<vmem>>, vector<16x8xbf16>
    %c0_69 = arith.constant 0 : index
    %c16_70 = arith.constant 16 : index
    %211 = vector.load %arg20[%c0_69, %c16_70] : memref<16x32xbf16, #tpu.memory_space<vmem>>, vector<16x8xbf16>
    %cst_71 = arith.constant dense<0.000000e+00> : vector<8x16xf32>
    %212 = tpu.matmul %209, %210, %cst_71 {dimension_numbers = #tpu.dot_dimension_numbers<[1], [1], [0], [0], [0, 0, 1, 0], [], []>} : vector<8x8xbf16>, vector<16x8xbf16>, vector<8x16xf32> -> vector<8x16xf32>
    %cst_72 = arith.constant dense<0.000000e+00> : vector<8x7xf32>
    %213 = tpu.matmul %209, %53, %cst_72 {dimension_numbers = #tpu.dot_dimension_numbers<[1], [0], [0], [1], [0, 0, 1, 1], [], []>} : vector<8x8xbf16>, vector<8x7xbf16>, vector<8x7xf32> -> vector<8x7xf32>
    %214 = vector.broadcast %54 : vector<1x7xf32> to vector<8x7xf32>
    %215 = arith.addf %213, %214 : vector<8x7xf32>
    %c-3_i32_73 = arith.constant -3 : i32
    %216 = vector.broadcast %c-3_i32_73 : i32 to vector<8x16xi32>
    %217 = arith.cmpi sle, %43, %216 : vector<8x16xi32>
    %218 = vector.extract_strided_slice %215 {offsets = [0, 0], sizes = [8, 1], strides = [1, 1]} : vector<8x7xf32> to vector<8x1xf32>
    %cst_74 = arith.constant 0.000000e+00 : f32
    %219 = vector.shape_cast %218 : vector<8x1xf32> to vector<8x1xf32>
    %220 = vector.broadcast %219 : vector<8x1xf32> to vector<8x16xf32>
    %221 = vector.broadcast %cst_74 : f32 to vector<8x16xf32>
    %222 = arith.select %217, %220, %221 : vector<8x16xi1>, vector<8x16xf32>
    %c3_i32_75 = arith.constant 3 : i32
    %223 = vector.broadcast %c3_i32_75 : i32 to vector<8x16xi32>
    %224 = arith.cmpi sge, %43, %223 : vector<8x16xi32>
    %225 = vector.extract_strided_slice %215 {offsets = [0, 6], sizes = [8, 1], strides = [1, 1]} : vector<8x7xf32> to vector<8x1xf32>
    %cst_76 = arith.constant 0.000000e+00 : f32
    %226 = vector.shape_cast %225 : vector<8x1xf32> to vector<8x1xf32>
    %227 = vector.broadcast %226 : vector<8x1xf32> to vector<8x16xf32>
    %228 = vector.broadcast %cst_76 : f32 to vector<8x16xf32>
    %229 = arith.select %224, %227, %228 : vector<8x16xi1>, vector<8x16xf32>
    %230 = arith.addf %222, %229 : vector<8x16xf32>
    %c-2_i32_77 = arith.constant -2 : i32
    %231 = vector.broadcast %c-2_i32_77 : i32 to vector<8x16xi32>
    %232 = arith.cmpi eq, %43, %231 : vector<8x16xi32>
    %233 = vector.extract_strided_slice %215 {offsets = [0, 1], sizes = [8, 1], strides = [1, 1]} : vector<8x7xf32> to vector<8x1xf32>
    %cst_78 = arith.constant 0.000000e+00 : f32
    %234 = vector.shape_cast %233 : vector<8x1xf32> to vector<8x1xf32>
    %235 = vector.broadcast %234 : vector<8x1xf32> to vector<8x16xf32>
    %236 = vector.broadcast %cst_78 : f32 to vector<8x16xf32>
    %237 = arith.select %232, %235, %236 : vector<8x16xi1>, vector<8x16xf32>
    %238 = arith.addf %230, %237 : vector<8x16xf32>
    %c-1_i32_79 = arith.constant -1 : i32
    %239 = vector.broadcast %c-1_i32_79 : i32 to vector<8x16xi32>
    %240 = arith.cmpi eq, %43, %239 : vector<8x16xi32>
    %241 = vector.extract_strided_slice %215 {offsets = [0, 2], sizes = [8, 1], strides = [1, 1]} : vector<8x7xf32> to vector<8x1xf32>
    %cst_80 = arith.constant 0.000000e+00 : f32
    %242 = vector.shape_cast %241 : vector<8x1xf32> to vector<8x1xf32>
    %243 = vector.broadcast %242 : vector<8x1xf32> to vector<8x16xf32>
    %244 = vector.broadcast %cst_80 : f32 to vector<8x16xf32>
    %245 = arith.select %240, %243, %244 : vector<8x16xi1>, vector<8x16xf32>
    %246 = arith.addf %238, %245 : vector<8x16xf32>
    %c0_i32_81 = arith.constant 0 : i32
    %247 = vector.broadcast %c0_i32_81 : i32 to vector<8x16xi32>
    %248 = arith.cmpi eq, %43, %247 : vector<8x16xi32>
    %249 = vector.extract_strided_slice %215 {offsets = [0, 3], sizes = [8, 1], strides = [1, 1]} : vector<8x7xf32> to vector<8x1xf32>
    %cst_82 = arith.constant 0.000000e+00 : f32
    %250 = vector.shape_cast %249 : vector<8x1xf32> to vector<8x1xf32>
    %251 = vector.broadcast %250 : vector<8x1xf32> to vector<8x16xf32>
    %252 = vector.broadcast %cst_82 : f32 to vector<8x16xf32>
    %253 = arith.select %248, %251, %252 : vector<8x16xi1>, vector<8x16xf32>
    %254 = arith.addf %246, %253 : vector<8x16xf32>
    %c1_i32_83 = arith.constant 1 : i32
    %255 = vector.broadcast %c1_i32_83 : i32 to vector<8x16xi32>
    %256 = arith.cmpi eq, %43, %255 : vector<8x16xi32>
    %257 = vector.extract_strided_slice %215 {offsets = [0, 4], sizes = [8, 1], strides = [1, 1]} : vector<8x7xf32> to vector<8x1xf32>
    %cst_84 = arith.constant 0.000000e+00 : f32
    %258 = vector.shape_cast %257 : vector<8x1xf32> to vector<8x1xf32>
    %259 = vector.broadcast %258 : vector<8x1xf32> to vector<8x16xf32>
    %260 = vector.broadcast %cst_84 : f32 to vector<8x16xf32>
    %261 = arith.select %256, %259, %260 : vector<8x16xi1>, vector<8x16xf32>
    %262 = arith.addf %254, %261 : vector<8x16xf32>
    %c2_i32_85 = arith.constant 2 : i32
    %263 = vector.broadcast %c2_i32_85 : i32 to vector<8x16xi32>
    %264 = arith.cmpi eq, %43, %263 : vector<8x16xi32>
    %265 = vector.extract_strided_slice %215 {offsets = [0, 5], sizes = [8, 1], strides = [1, 1]} : vector<8x7xf32> to vector<8x1xf32>
    %cst_86 = arith.constant 0.000000e+00 : f32
    %266 = vector.shape_cast %265 : vector<8x1xf32> to vector<8x1xf32>
    %267 = vector.broadcast %266 : vector<8x1xf32> to vector<8x16xf32>
    %268 = vector.broadcast %cst_86 : f32 to vector<8x16xf32>
    %269 = arith.select %264, %267, %268 : vector<8x16xi1>, vector<8x16xf32>
    %270 = arith.addf %262, %269 : vector<8x16xf32>
    %271 = arith.addf %212, %270 : vector<8x16xf32>
    %272 = arith.addf %271, %52 : vector<8x16xf32>
    %cst_87 = arith.constant dense<0xFF800000> : vector<8xf32>
    %273 = vector.multi_reduction <maximumf>, %272, %cst_87 [1] : vector<8x16xf32> to vector<8xf32>
    %274 = vector.shape_cast %273 : vector<8xf32> to vector<8x1xf32>
    %275 = vector.broadcast %274 : vector<8x1xf32> to vector<8x16xf32>
    %276 = arith.subf %272, %275 : vector<8x16xf32>
    %277 = math.exp %276 : vector<8x16xf32>
    %cst_88 = arith.constant dense<0.000000e+00> : vector<8xf32>
    %278 = vector.multi_reduction <add>, %277, %cst_88 [1] : vector<8x16xf32> to vector<8xf32>
    %279 = vector.shape_cast %278 : vector<8xf32> to vector<8x1xf32>
    %280 = tpu.reciprocal %279 {approx = true} : vector<8x1xf32> -> vector<8x1xf32>
    %281 = vector.broadcast %280 : vector<8x1xf32> to vector<8x16xf32>
    %282 = arith.mulf %277, %281 : vector<8x16xf32>
    %283 = arith.truncf %282 : vector<8x16xf32> to vector<8x16xbf16>
    %cst_89 = arith.constant dense<0.000000e+00> : vector<8x8xf32>
    %284 = tpu.matmul %283, %211, %cst_89 {dimension_numbers = #tpu.dot_dimension_numbers<[1], [0], [0], [1], [0, 0, 1, 1], [], []>} : vector<8x16xbf16>, vector<16x8xbf16>, vector<8x8xf32> -> vector<8x8xf32>
    %c0_90 = arith.constant 0 : index
    %c16_91 = arith.constant 16 : index
    %285 = vector.load %arg21[%c0_90, %c16_91] : memref<8x32xf32, #tpu.memory_space<vmem>>, vector<8x8xf32>
    tpu.vector_store %arg21[%c0_90, %c16_91], %284 {strides = array<i32>} : memref<8x32xf32, #tpu.memory_space<vmem>>, vector<8x8xf32>,
    %286 = vector.extract_strided_slice %38 {offsets = [0, 24], sizes = [8, 8], strides = [1, 1]} : vector<8x32xbf16> to vector<8x8xbf16>
    %c0_92 = arith.constant 0 : index
    %c24 = arith.constant 24 : index
    %287 = vector.load %arg19[%c0_92, %c24] : memref<16x32xbf16, #tpu.memory_space<vmem>>, vector<16x8xbf16>
    %c0_93 = arith.constant 0 : index
    %c24_94 = arith.constant 24 : index
    %288 = vector.load %arg20[%c0_93, %c24_94] : memref<16x32xbf16, #tpu.memory_space<vmem>>, vector<16x8xbf16>
    %cst_95 = arith.constant dense<0.000000e+00> : vector<8x16xf32>
    %289 = tpu.matmul %286, %287, %cst_95 {dimension_numbers = #tpu.dot_dimension_numbers<[1], [1], [0], [0], [0, 0, 1, 0], [], []>} : vector<8x8xbf16>, vector<16x8xbf16>, vector<8x16xf32> -> vector<8x16xf32>
    %cst_96 = arith.constant dense<0.000000e+00> : vector<8x7xf32>
    %290 = tpu.matmul %286, %53, %cst_96 {dimension_numbers = #tpu.dot_dimension_numbers<[1], [0], [0], [1], [0, 0, 1, 1], [], []>} : vector<8x8xbf16>, vector<8x7xbf16>, vector<8x7xf32> -> vector<8x7xf32>
    %291 = vector.broadcast %54 : vector<1x7xf32> to vector<8x7xf32>
    %292 = arith.addf %290, %291 : vector<8x7xf32>
    %c-3_i32_97 = arith.constant -3 : i32
    %293 = vector.broadcast %c-3_i32_97 : i32 to vector<8x16xi32>
    %294 = arith.cmpi sle, %43, %293 : vector<8x16xi32>
    %295 = vector.extract_strided_slice %292 {offsets = [0, 0], sizes = [8, 1], strides = [1, 1]} : vector<8x7xf32> to vector<8x1xf32>
    %cst_98 = arith.constant 0.000000e+00 : f32
    %296 = vector.shape_cast %295 : vector<8x1xf32> to vector<8x1xf32>
    %297 = vector.broadcast %296 : vector<8x1xf32> to vector<8x16xf32>
    %298 = vector.broadcast %cst_98 : f32 to vector<8x16xf32>
    %299 = arith.select %294, %297, %298 : vector<8x16xi1>, vector<8x16xf32>
    %c3_i32_99 = arith.constant 3 : i32
    %300 = vector.broadcast %c3_i32_99 : i32 to vector<8x16xi32>
    %301 = arith.cmpi sge, %43, %300 : vector<8x16xi32>
    %302 = vector.extract_strided_slice %292 {offsets = [0, 6], sizes = [8, 1], strides = [1, 1]} : vector<8x7xf32> to vector<8x1xf32>
    %cst_100 = arith.constant 0.000000e+00 : f32
    %303 = vector.shape_cast %302 : vector<8x1xf32> to vector<8x1xf32>
    %304 = vector.broadcast %303 : vector<8x1xf32> to vector<8x16xf32>
    %305 = vector.broadcast %cst_100 : f32 to vector<8x16xf32>
    %306 = arith.select %301, %304, %305 : vector<8x16xi1>, vector<8x16xf32>
    %307 = arith.addf %299, %306 : vector<8x16xf32>
    %c-2_i32_101 = arith.constant -2 : i32
    %308 = vector.broadcast %c-2_i32_101 : i32 to vector<8x16xi32>
    %309 = arith.cmpi eq, %43, %308 : vector<8x16xi32>
    %310 = vector.extract_strided_slice %292 {offsets = [0, 1], sizes = [8, 1], strides = [1, 1]} : vector<8x7xf32> to vector<8x1xf32>
    %cst_102 = arith.constant 0.000000e+00 : f32
    %311 = vector.shape_cast %310 : vector<8x1xf32> to vector<8x1xf32>
    %312 = vector.broadcast %311 : vector<8x1xf32> to vector<8x16xf32>
    %313 = vector.broadcast %cst_102 : f32 to vector<8x16xf32>
    %314 = arith.select %309, %312, %313 : vector<8x16xi1>, vector<8x16xf32>
    %315 = arith.addf %307, %314 : vector<8x16xf32>
    %c-1_i32_103 = arith.constant -1 : i32
    %316 = vector.broadcast %c-1_i32_103 : i32 to vector<8x16xi32>
    %317 = arith.cmpi eq, %43, %316 : vector<8x16xi32>
    %318 = vector.extract_strided_slice %292 {offsets = [0, 2], sizes = [8, 1], strides = [1, 1]} : vector<8x7xf32> to vector<8x1xf32>
    %cst_104 = arith.constant 0.000000e+00 : f32
    %319 = vector.shape_cast %318 : vector<8x1xf32> to vector<8x1xf32>
    %320 = vector.broadcast %319 : vector<8x1xf32> to vector<8x16xf32>
    %321 = vector.broadcast %cst_104 : f32 to vector<8x16xf32>
    %322 = arith.select %317, %320, %321 : vector<8x16xi1>, vector<8x16xf32>
    %323 = arith.addf %315, %322 : vector<8x16xf32>
    %c0_i32_105 = arith.constant 0 : i32
    %324 = vector.broadcast %c0_i32_105 : i32 to vector<8x16xi32>
    %325 = arith.cmpi eq, %43, %324 : vector<8x16xi32>
    %326 = vector.extract_strided_slice %292 {offsets = [0, 3], sizes = [8, 1], strides = [1, 1]} : vector<8x7xf32> to vector<8x1xf32>
    %cst_106 = arith.constant 0.000000e+00 : f32
    %327 = vector.shape_cast %326 : vector<8x1xf32> to vector<8x1xf32>
    %328 = vector.broadcast %327 : vector<8x1xf32> to vector<8x16xf32>
    %329 = vector.broadcast %cst_106 : f32 to vector<8x16xf32>
    %330 = arith.select %325, %328, %329 : vector<8x16xi1>, vector<8x16xf32>
    %331 = arith.addf %323, %330 : vector<8x16xf32>
    %c1_i32_107 = arith.constant 1 : i32
    %332 = vector.broadcast %c1_i32_107 : i32 to vector<8x16xi32>
    %333 = arith.cmpi eq, %43, %332 : vector<8x16xi32>
    %334 = vector.extract_strided_slice %292 {offsets = [0, 4], sizes = [8, 1], strides = [1, 1]} : vector<8x7xf32> to vector<8x1xf32>
    %cst_108 = arith.constant 0.000000e+00 : f32
    %335 = vector.shape_cast %334 : vector<8x1xf32> to vector<8x1xf32>
    %336 = vector.broadcast %335 : vector<8x1xf32> to vector<8x16xf32>
    %337 = vector.broadcast %cst_108 : f32 to vector<8x16xf32>
    %338 = arith.select %333, %336, %337 : vector<8x16xi1>, vector<8x16xf32>
    %339 = arith.addf %331, %338 : vector<8x16xf32>
    %c2_i32_109 = arith.constant 2 : i32
    %340 = vector.broadcast %c2_i32_109 : i32 to vector<8x16xi32>
    %341 = arith.cmpi eq, %43, %340 : vector<8x16xi32>
    %342 = vector.extract_strided_slice %292 {offsets = [0, 5], sizes = [8, 1], strides = [1, 1]} : vector<8x7xf32> to vector<8x1xf32>
    %cst_110 = arith.constant 0.000000e+00 : f32
    %343 = vector.shape_cast %342 : vector<8x1xf32> to vector<8x1xf32>
    %344 = vector.broadcast %343 : vector<8x1xf32> to vector<8x16xf32>
    %345 = vector.broadcast %cst_110 : f32 to vector<8x16xf32>
    %346 = arith.select %341, %344, %345 : vector<8x16xi1>, vector<8x16xf32>
    %347 = arith.addf %339, %346 : vector<8x16xf32>
    %348 = arith.addf %289, %347 : vector<8x16xf32>
    %349 = arith.addf %348, %52 : vector<8x16xf32>
    %cst_111 = arith.constant dense<0xFF800000> : vector<8xf32>
    %350 = vector.multi_reduction <maximumf>, %349, %cst_111 [1] : vector<8x16xf32> to vector<8xf32>
    %351 = vector.shape_cast %350 : vector<8xf32> to vector<8x1xf32>
    %352 = vector.broadcast %351 : vector<8x1xf32> to vector<8x16xf32>
    %353 = arith.subf %349, %352 : vector<8x16xf32>
    %354 = math.exp %353 : vector<8x16xf32>
    %cst_112 = arith.constant dense<0.000000e+00> : vector<8xf32>
    %355 = vector.multi_reduction <add>, %354, %cst_112 [1] : vector<8x16xf32> to vector<8xf32>
    %356 = vector.shape_cast %355 : vector<8xf32> to vector<8x1xf32>
    %357 = tpu.reciprocal %356 {approx = true} : vector<8x1xf32> -> vector<8x1xf32>
    %358 = vector.broadcast %357 : vector<8x1xf32> to vector<8x16xf32>
    %359 = arith.mulf %354, %358 : vector<8x16xf32>
    %360 = arith.truncf %359 : vector<8x16xf32> to vector<8x16xbf16>
    %cst_113 = arith.constant dense<0.000000e+00> : vector<8x8xf32>
    %361 = tpu.matmul %360, %288, %cst_113 {dimension_numbers = #tpu.dot_dimension_numbers<[1], [0], [0], [1], [0, 0, 1, 1], [], []>} : vector<8x16xbf16>, vector<16x8xbf16>, vector<8x8xf32> -> vector<8x8xf32>
    %c0_114 = arith.constant 0 : index
    %c24_115 = arith.constant 24 : index
    %362 = vector.load %arg21[%c0_114, %c24_115] : memref<8x32xf32, #tpu.memory_space<vmem>>, vector<8x8xf32>
    tpu.vector_store %arg21[%c0_114, %c24_115], %361 {strides = array<i32>} : memref<8x32xf32, #tpu.memory_space<vmem>>, vector<8x8xf32>,
    %c0_116 = arith.constant 0 : index
    %c0_117 = arith.constant 0 : index
    %363 = vector.load %arg21[%c0_116, %c0_117] : memref<8x32xf32, #tpu.memory_space<vmem>>, vector<8x32xf32>
    %364 = arith.addf %9, %363 : vector<8x32xf32>
    %c0_118 = arith.constant 0 : index
    %c0_119 = arith.constant 0 : index
    %365 = vector.load %arg12[%c0_118, %c0_119] : memref<1x32xf32, #tpu.memory_space<vmem>>, vector<1x32xf32>
    %c0_120 = arith.constant 0 : index
    %c0_121 = arith.constant 0 : index
    %366 = vector.load %arg13[%c0_120, %c0_121] : memref<1x32xf32, #tpu.memory_space<vmem>>, vector<1x32xf32>
    %cst_122 = arith.constant dense<0.000000e+00> : vector<8xf32>
    %367 = vector.multi_reduction <add>, %364, %cst_122 [1] : vector<8x32xf32> to vector<8xf32>
    %368 = vector.shape_cast %367 : vector<8xf32> to vector<8x1xf32>
    %cst_123 = arith.constant 3.200000e+01 : f32
    %369 = vector.broadcast %cst_123 : f32 to vector<8x1xf32>
    %370 = arith.divf %368, %369 : vector<8x1xf32>
    %371 = vector.broadcast %370 : vector<8x1xf32> to vector<8x32xf32>
    %372 = arith.subf %364, %371 : vector<8x32xf32>
    %373 = arith.mulf %372, %372 : vector<8x32xf32>
    %cst_124 = arith.constant dense<0.000000e+00> : vector<8xf32>
    %374 = vector.multi_reduction <add>, %373, %cst_124 [1] : vector<8x32xf32> to vector<8xf32>
    %375 = vector.shape_cast %374 : vector<8xf32> to vector<8x1xf32>
    %cst_125 = arith.constant 3.200000e+01 : f32
    %376 = vector.broadcast %cst_125 : f32 to vector<8x1xf32>
    %377 = arith.divf %375, %376 : vector<8x1xf32>
    %378 = vector.broadcast %370 : vector<8x1xf32> to vector<8x32xf32>
    %379 = arith.subf %364, %378 : vector<8x32xf32>
    %cst_126 = arith.constant 9.99999997E-7 : f32
    %380 = vector.broadcast %cst_126 : f32 to vector<8x1xf32>
    %381 = arith.addf %377, %380 : vector<8x1xf32>
    %382 = math.rsqrt %381 : vector<8x1xf32>
    %383 = vector.broadcast %382 : vector<8x1xf32> to vector<8x32xf32>
    %384 = arith.mulf %379, %383 : vector<8x32xf32>
    %385 = vector.broadcast %365 : vector<1x32xf32> to vector<8x32xf32>
    %386 = arith.mulf %384, %385 : vector<8x32xf32>
    %387 = vector.broadcast %366 : vector<1x32xf32> to vector<8x32xf32>
    %388 = arith.addf %386, %387 : vector<8x32xf32>
    %389 = arith.truncf %388 : vector<8x32xf32> to vector<8x32xbf16>
    %c0_127 = arith.constant 0 : index
    %c0_128 = arith.constant 0 : index
    %390 = vector.load %arg14[%c0_127, %c0_128] : memref<32x128xbf16, #tpu.memory_space<vmem>>, vector<32x128xbf16>
    %cst_129 = arith.constant dense<0.000000e+00> : vector<8x128xf32>
    %391 = tpu.matmul %389, %390, %cst_129 {dimension_numbers = #tpu.dot_dimension_numbers<[1], [0], [0], [1], [0, 0, 1, 1], [], []>} : vector<8x32xbf16>, vector<32x128xbf16>, vector<8x128xf32> -> vector<8x128xf32>
    %c0_130 = arith.constant 0 : index
    %c0_131 = arith.constant 0 : index
    %392 = vector.load %arg15[%c0_130, %c0_131] : memref<1x128xf32, #tpu.memory_space<vmem>>, vector<1x128xf32>
    %393 = vector.broadcast %392 : vector<1x128xf32> to vector<8x128xf32>
    %394 = arith.addf %391, %393 : vector<8x128xf32>
    %cst_132 = arith.constant 5.000000e-01 : f32
    %395 = vector.broadcast %cst_132 : f32 to vector<8x128xf32>
    %396 = arith.mulf %395, %394 : vector<8x128xf32>
    %cst_133 = arith.constant 0.707106769 : f32
    %397 = vector.broadcast %cst_133 : f32 to vector<8x128xf32>
    %398 = arith.mulf %394, %397 : vector<8x128xf32>
    %399 = math.erf %398 : vector<8x128xf32>
    %cst_134 = arith.constant 1.000000e+00 : f32
    %400 = vector.broadcast %cst_134 : f32 to vector<8x128xf32>
    %401 = arith.addf %400, %399 : vector<8x128xf32>
    %402 = arith.mulf %396, %401 : vector<8x128xf32>
    %403 = arith.truncf %402 : vector<8x128xf32> to vector<8x128xbf16>
    %c0_135 = arith.constant 0 : index
    %c0_136 = arith.constant 0 : index
    %404 = vector.load %arg16[%c0_135, %c0_136] : memref<128x32xbf16, #tpu.memory_space<vmem>>, vector<128x32xbf16>
    %cst_137 = arith.constant dense<0.000000e+00> : vector<8x32xf32>
    %405 = tpu.matmul %403, %404, %cst_137 {dimension_numbers = #tpu.dot_dimension_numbers<[1], [0], [0], [1], [0, 0, 1, 1], [], []>} : vector<8x128xbf16>, vector<128x32xbf16>, vector<8x32xf32> -> vector<8x32xf32>
    %406 = arith.addf %364, %405 : vector<8x32xf32>
    %c0_138 = arith.constant 0 : index
    %c0_139 = arith.constant 0 : index
    %407 = vector.load %arg17[%c0_138, %c0_139] : memref<1x32xf32, #tpu.memory_space<vmem>>, vector<1x32xf32>
    %408 = vector.broadcast %407 : vector<1x32xf32> to vector<8x32xf32>
    %409 = arith.addf %406, %408 : vector<8x32xf32>
    %c0_140 = arith.constant 0 : index
    %c0_141 = arith.constant 0 : index
    %c0_142 = arith.constant 0 : index
    %410 = vector.load %arg18[%c0_140, %c0_141, %c0_142] : memref<1x8x32xf32, #tpu.memory_space<vmem>>, vector<1x8x32xf32>
    %411 = vector.shape_cast %410 : vector<1x8x32xf32> to vector<8x32xf32>
    %412 = vector.shape_cast %409 : vector<8x32xf32> to vector<1x8x32xf32>
    tpu.vector_store %arg18[%c0_140, %c0_141, %c0_142], %412 {strides = array<i32>} : memref<1x8x32xf32, #tpu.memory_space<vmem>>, vector<1x8x32xf32>,
    return
  }
  func.func @transform_0(%arg0: i32, %arg1: i32) -> (i32, i32, i32) {
    %c0_i32 = arith.constant 0 : i32
    %c0_i32_0 = arith.constant 0 : i32
    %c0_i32_1 = arith.constant 0 : i32
    return %arg0, %c0_i32, %c0_i32_0 : i32, i32, i32
  }
  func.func @transform_1(%arg0: i32, %arg1: i32) -> (i32, i32, i32) {
    %c0_i32 = arith.constant 0 : i32
    %c0_i32_0 = arith.constant 0 : i32
    %c0_i32_1 = arith.constant 0 : i32
    return %arg0, %c0_i32, %c0_i32_0 : i32, i32, i32
  }
  func.func @transform_2(%arg0: i32, %arg1: i32) -> (i32, i32) {
    %c0_i32 = arith.constant 0 : i32
    %c0_i32_0 = arith.constant 0 : i32
    %c0_i32_1 = arith.constant 0 : i32
    return %c0_i32, %c0_i32_0 : i32, i32
  }
  func.func @transform_3(%arg0: i32, %arg1: i32) -> (i32, i32) {
    %c0_i32 = arith.constant 0 : i32
    %c0_i32_0 = arith.constant 0 : i32
    %c0_i32_1 = arith.constant 0 : i32
    return %c0_i32, %c0_i32_0 : i32, i32
  }
  func.func @transform_4(%arg0: i32, %arg1: i32) -> (i32, i32) {
    %c0_i32 = arith.constant 0 : i32
    %c0_i32_0 = arith.constant 0 : i32
    %c0_i32_1 = arith.constant 0 : i32
    return %c0_i32, %c0_i32_0 : i32, i32
  }
  func.func @transform_5(%arg0: i32, %arg1: i32) -> (i32, i32) {
    %c0_i32 = arith.constant 0 : i32
    %c0_i32_0 = arith.constant 0 : i32
    %c0_i32_1 = arith.constant 0 : i32
    return %c0_i32, %c0_i32_0 : i32, i32
  }
  func.func @transform_6(%arg0: i32, %arg1: i32) -> (i32, i32) {
    %c0_i32 = arith.constant 0 : i32
    %c0_i32_0 = arith.constant 0 : i32
    %c0_i32_1 = arith.constant 0 : i32
    return %c0_i32, %c0_i32_0 : i32, i32
  }
  func.func @transform_7(%arg0: i32, %arg1: i32) -> (i32, i32) {
    %c0_i32 = arith.constant 0 : i32
    %c0_i32_0 = arith.constant 0 : i32
    %c0_i32_1 = arith.constant 0 : i32
    return %c0_i32, %c0_i32_0 : i32, i32
  }
  func.func @transform_8(%arg0: i32, %arg1: i32) -> (i32, i32) {
    %c0_i32 = arith.constant 0 : i32
    %c0_i32_0 = arith.constant 0 : i32
    %c0_i32_1 = arith.constant 0 : i32
    return %c0_i32, %c0_i32_0 : i32, i32
  }
  func.func @transform_9(%arg0: i32, %arg1: i32) -> (i32, i32) {
    %c0_i32 = arith.constant 0 : i32
    %c0_i32_0 = arith.constant 0 : i32
    %c0_i32_1 = arith.constant 0 : i32
    return %c0_i32, %c0_i32_0 : i32, i32
  }
  func.func @transform_10(%arg0: i32, %arg1: i32) -> (i32, i32) {
    %c0_i32 = arith.constant 0 : i32
    %c0_i32_0 = arith.constant 0 : i32
    %c0_i32_1 = arith.constant 0 : i32
    return %c0_i32, %c0_i32_0 : i32, i32
  }
  func.func @transform_11(%arg0: i32, %arg1: i32) -> (i32, i32) {
    %c0_i32 = arith.constant 0 : i32
    %c0_i32_0 = arith.constant 0 : i32
    %c0_i32_1 = arith.constant 0 : i32
    return %c0_i32, %c0_i32_0 : i32, i32
  }
  func.func @transform_12(%arg0: i32, %arg1: i32) -> (i32, i32) {
    %c0_i32 = arith.constant 0 : i32
    %c0_i32_0 = arith.constant 0 : i32
    %c0_i32_1 = arith.constant 0 : i32
    return %c0_i32, %c0_i32_0 : i32, i32
  }
  func.func @transform_13(%arg0: i32, %arg1: i32) -> (i32, i32) {
    %c0_i32 = arith.constant 0 : i32
    %c0_i32_0 = arith.constant 0 : i32
    %c0_i32_1 = arith.constant 0 : i32
    return %c0_i32, %c0_i32_0 : i32, i32
  }
  func.func @transform_14(%arg0: i32, %arg1: i32) -> (i32, i32) {
    %c0_i32 = arith.constant 0 : i32
    %c0_i32_0 = arith.constant 0 : i32
    %c0_i32_1 = arith.constant 0 : i32
    return %c0_i32, %c0_i32_0 : i32, i32
  }
  func.func @transform_15(%arg0: i32, %arg1: i32) -> (i32, i32) {
    %c0_i32 = arith.constant 0 : i32
    %c0_i32_0 = arith.constant 0 : i32
    %c0_i32_1 = arith.constant 0 : i32
    return %c0_i32, %c0_i32_0 : i32, i32
  }
  func.func @transform_16(%arg0: i32, %arg1: i32) -> (i32, i32, i32) {
    %c0_i32 = arith.constant 0 : i32
    %c0_i32_0 = arith.constant 0 : i32
    return %arg0, %arg1, %c0_i32 : i32, i32, i32
  }
}

</mosaic_0001>

<bundles_post_ra>
// kernel: tpu_custom_call.1
= control target key start
LH: loop header
LB: loop body
LE: loop exit
PB: predicated region body
PF: predicated region fallthrough
CT: control target
= control target key end

     0   :  { %s2997_s0 = inlined_call_operand.vmem [shape: f32[2,16,32], index: 0, kind: input, shape index: {}]   ;;  %s2998_s1 = inlined_call_operand.vmem [shape: f32[2,1,16], index: 1, kind: input, shape index: {}]   ;;  %s2999_s2 = inlined_call_operand.vmem [shape: f32[1,32], index: 2, kind: input, shape index: {}]   ;;  %s3000_s3 = inlined_call_operand.vmem [shape: f32[1,32], index: 3, kind: input, shape index: {}]   ;;  %s3001_s4 = inlined_call_operand.vmem [shape: bf16[32,32], index: 4, kind: input, shape index: {}]   ;;  %s3002_s5 = inlined_call_operand.vmem [shape: f32[1,32], index: 5, kind: input, shape index: {}]   ;;  %s3003_s6 = inlined_call_operand.vmem [shape: bf16[32,64], index: 6, kind: input, shape index: {}]   ;;  %s3004_s7 = inlined_call_operand.vmem [shape: f32[1,64], index: 7, kind: input, shape index: {}]   ;;  %s3005_s8 = inlined_call_operand.vmem [shape: bf16[8,7], index: 8, kind: input, shape index: {}]   ;;  %s3006_s9 = inlined_call_operand.vmem [shape: f32[1,7], index: 9, kind: input, shape index: {}]   ;;  %s3007_s10 = inlined_call_operand.vmem [shape: f32[1,32], index: 10, kind: input, shape index: {}]   ;;  %s3008_s11 = inlined_call_operand.vmem [shape: f32[1,32], index: 11, kind: input, shape index: {}]   ;;  %s3009_s12 = inlined_call_operand.vmem [shape: bf16[32,128], index: 12, kind: input, shape index: {}]   ;;  %s3010_s13 = inlined_call_operand.vmem [shape: f32[1,128], index: 13, kind: input, shape index: {}]   ;;  %s3011_s14 = inlined_call_operand.vmem [shape: bf16[128,32], index: 14, kind: input, shape index: {}]   ;;  %s3012_s15 = inlined_call_operand.vmem [shape: f32[1,32], index: 15, kind: input, shape index: {}]   ;;  %s3013_s16 = inlined_call_operand.hbm [shape: f32[2,16,32], index: 16, kind: output, shape index: {}]  }
   0x1   :  { %3022 = sst [smem:[#allocation16_spill]] %s2997_s0 }
   0x2   :  { %3023 = sst [smem:[#allocation17_spill]] %s2999_s2 }
   0x3   :  { %3024 = sst [smem:[#allocation18_spill]] %s3012_s15 }
   0x4   :  { %3025 = sst [smem:[#allocation19_spill]] %s3013_s16 }
   0x5   :  { %21 = vsyncpa [#allocation6], 0 }
   0x6   :  { %23 = vsyncpa [#allocation6 + $0x1], 0  ;;  %s2490_s21 = smov 0   ;;  %s2492_s22 = smov 0  }
   0x7   :  { %s2494_s23 = smov 0   ;;  %s2496_s24 = smov 0  }
   0x8   :  { %s2498_s25 = smov 0   ;;  %s2500_s26 = smov 0  }
   0x9   :  { %s2502_s27 = smov 0   ;;  %s2504_s28 = smov 0  }
   0xa LB: > { %3026 = sst [smem:[#allocation8_spill]] %s2355_s21  ;;  %s1921_s29 = sadd.s32 4294967295, %s2383_s28   ;;  %s2383_s28 = sphi %s2504_s28, %s29_s28   ;;  %s2379_s27 = sphi %s2502_s27, %s3050_s27   ;;  %s2375_s26 = sphi %s2500_s26, %s3046_s26   ;;  %s2371_s25 = sphi %s2498_s25, %s3045_s25   ;;  %s2367_s24 = sphi %s2496_s24, %s3044_s24   ;;  %s2363_s23 = sphi %s2494_s23, %s3043_s23   ;;  %s2359_s22 = sphi %s2492_s22, %s3049_s22   ;;  %s2355_s21 = sphi %s2490_s21, %s3048_s21  }
   0xb   : > { %3027 = sst [smem:[#allocation9_spill]] %s2363_s23  ;;  %s1922_s30 = sadd.s32 4294967294, %s2383_s28  }
   0xc   : > { %3028 = sst [smem:[#allocation10_spill]] %s2375_s26  ;;  %s38_s0 = sadd.s32 1, %s2375_s26 }
   0xd   : > { %3029 = sst [smem:[#allocation11_spill]] %s2379_s27  ;;  %p39_p0 = scmp.ge.s32.totalorder %s38_s0, 2 }
   0xe   : > { %s41_s17 = sadd.s32 1, %s2379_s27  ;;  %p406_p1 = scmp.ne.s32.totalorder %s2363_s23, %s2359_s22 }
   0xf   : > { %p407_p2 = scmp.eq.s32.totalorder %s1921_s29, 3  ;;  %s3052_s0 = smov (%p39_p0, %s38_s0), 0 }
  0x10   : > { %3030 = sst [smem:[#allocation12_spill]] %s3052_s0  ;;  %s3054_s17 = smov (!%p39_p0, %s41_s17), %s2379_s27 }
  0x11   : > { %s392_s18 = ssub.s32 %s2375_s26, %s3052_s0  ;;  %p2541_p3 = por %p407_p2, %p406_p1 }
  0x12   : > { %p43_p4 = scmp.ge.s32.totalorder %s3054_s17, 2  ;;  %p412_p5 = scmp.ne.s32.totalorder %s2359_s22, %s2355_s21 }
  0x13   : > { %p413_p6 = scmp.eq.s32.totalorder %s1922_s30, 3  ;;  %p1925_p7 = scmp.ge.s32.totalorder %s2383_s28, 1 }
  0x14   : > { %s3056_s17 = smov (%p43_p4, %s3054_s17), 0  ;;  %p487_p9 = scmp.lt.s32.totalorder %s2383_s28, 5 }
  0x15   : > { %3032 = sst [smem:[#allocation13_spill]] %s3056_s17  ;;  %p2550_p8 = por %p413_p6, %p412_p5 }
  0x16   : > { %s391_s29 = ssub.s32 %s2379_s27, %s3056_s17  ;;  %s396_s16 = sadd.s32 1, %s2363_s23 }
  0x17   : > { %s3033_s20 = scalar_select %p2550_p8, 1, 0 }
  0x18   : > { %s393_s15 = sor.u32 %s392_s18, %s391_s29  ;;  %p488_p10 = pnand %p1925_p7, %p487_p9 }
  0x19   : > { %3034 = sst [smem:[#allocation14_spill]] %s3033_s20  ;;  %p394_p11 = scmp.eq.s32.totalorder %s393_s15, 0  ;;  %v2571_v1 = vld [vmem:[%s3000_s3] sm:$0x1] (!%p488_p10) }
  0x1a   : > { %491 = sbr.rel (%p488_p10) target bundleno = 4650 (0x122a), region = 84  ;;  %s537_s30 = sand.u32 (!%p488_p10), 1, %s2359_s22  }
  0x1b   : > { %s2559_s0 = scalar_select %p394_p11, %s2363_s23, %s396_s16  }
  0x1c   : > { %p540_p12 = scmp.lt.s32.totalorder (!%p488_p10), %s2371_s25, 1  ;;  %s3036_s2 = sld [smem:[#allocation17_spill]] (!%p488_p10) }
  0x1d   : > { %3035 = sst [smem:[#allocation15_spill]] %s2559_s0  ;;  %s2575_s15 = sshll.u32 (!%p488_p10), %s537_s30, 3 }
  0x1e   : > { %s3037_s0 = sld [smem:[#allocation16_spill]] (!%p488_p10)  ;;  %s539_s17 = scalar_lea.vmem (!%p488_p10), [#allocation5], %s2575_s15 }
  0x1f   : > { %p1929_p13 = scmp.ne.s32.totalorder (!%p488_p10), %s2367_s24, 0 }
  0x21   : > { %s2578_s16 = scalar_select %p540_p12, %s2371_s25, 1 }
  0x22   : > { %v2566_v0 = vld [vmem:[%s3036_s2] sm:$0x1]  ;;  %554 = sbr.rel (%p1929_p13) target bundleno = 691 (0x2b3), region = 88  ;;  %vm557_vm0 = vcmask (!%p1929_p13), 261120   ;;  %v2385_v17 = vmov (!%p1929_p13), 0.0   ;;  %v2222_v18 = vld [vmem:[%s3003_s6 + $0x8] sm:$0xff] (!%p1929_p13)   ;;  %v586_v23 = vlaneseq (!%p1929_p13) }
  0x23   : > { %s1972_s18 = sshll.u32 %s2578_s16, 4  ;;  %s547_s21 = scalar_lea.vmem %s2998_s1, %s2578_s16  ;;  %v2221_v16 = vld [vmem:[%s3003_s6] sm:$0xff] (!%p1929_p13)   ;;  %2015 = vmatprep.subr.bf16.mxu0 (!%p1929_p13), %v2385_v17  ;;  %vm2386_vm1 = vmmov (!%p1929_p13), 0  }
  0x24   : > { %s2588_s23 = scalar_lea.vmem %s3037_s0, %s1972_s18  ;;  %2016 = vmatpush3.bf16.msra.mxu0 (!%p1929_p13), %v2221_v16  ;;  %2019 = vmatprep.mubr.msk.bf16.mxu0 (!%p1929_p13), %vm2386_vm1, %v2385_v17  ;;  %v587_v26 = vshrl.u32 (!%p1929_p13), %v586_v23, 7  ;;  %v1930_v39 = vld [vmem:[%s3004_s7] ss:$0 sm:$0xff] (!%p1929_p13)  ;;  %s2387_s26 = smov (!%p1929_p13), 96  }
  0x25   : > { %v555_v2 = vld [vmem:[%s2588_s23] sm:$0xff] (!%p1929_p13)  ;;  %v556_v3 = vld [vmem:[%s2588_s23 + $0x8] sm:$0xff] (!%p1929_p13)  ;;  %2017 = vmatprep.subr.bf16.mxu0 (!%p1929_p13), %v2385_v17 }
  0x26   : > { %v558_v4 = vsel (!%p1929_p13), %vm557_vm0, %v555_v2, 0.0  ;;  %v561_v5 = vsel (!%p1929_p13), %vm557_vm0, %v556_v3, 0.0  ;;  %v588_v27 = vsub.s32 (!%p1929_p13), 0, %v587_v26 }
  0x27   : > { %559 = vadd.xlane.f32.xlu0 (!%p1929_p13), %v558_v4 }
  0x28   : > { %2018 = vmatpush3.bf16.msra.mxu0 (!%p1929_p13), %v2222_v18  ;;  %v589_v30 = vrot.slane (!%p1929_p13), %v2566_v0, %v588_v27  ;;  %v597_v34 = vrot.slane (!%p1929_p13), %v2571_v1, %v588_v27 }
  0x2b   : > { %562 = vadd.xlane.f32.xlu0 %v561_v5 }
  0xb4   : > { %v560_v6 = vpop.xlane.xlu0 %559 }
  0xb5   : > { %v565_v7 = vmul.f32 0.03125, %v560_v6 }
  0xb7   : > { %v567_v8 = vsub.f32 %v555_v2, %v565_v7 }
  0xb8   : > { %v563_v9 = vpop.xlane.xlu0 %562 }
  0xb9   : > { %v566_v10 = vmul.f32 0.03125, %v563_v9  ;;  %v569_v11 = vmul.f32 %v567_v8, %v567_v8 }
  0xbb   : > { %v568_v12 = vsub.f32 %v556_v3, %v566_v10  ;;  %v571_v13 = vsel %vm557_vm0, %v569_v11, 0.0 }
  0xbc   : > { %572 = vadd.xlane.f32.xlu1 %v571_v13 }
  0xbd   : > { %v570_v14 = vmul.f32 %v568_v12, %v568_v12 }
  0xbf   : > { %v574_v15 = vsel %vm557_vm0, %v570_v14, 0.0 }
  0xc0   : > { %575 = vadd.xlane.f32.xlu1 %v574_v15 }
 0x149   : > { %v573_v19 = vpop.xlane.xlu1 %572 }
 0x14a   : > { %v577_v20 = vmul.f32 0.03125, %v573_v19 }
 0x14c   : > { %v579_v21 = vadd.f32 1e-06, %v577_v20 }
 0x14d   : > { %v576_v22 = vpop.xlane.xlu1 %575 }
 0x14e   : > { %2223 = vrsqrt.f32 %v579_v21  ;;  %v578_v24 = vmul.f32 0.03125, %v576_v22 }
 0x150   : > { %v580_v25 = vadd.f32 1e-06, %v578_v24 }
 0x152   : > { %2225 = vrsqrt.f32 %v580_v25 }
 0x158   : > { %v2224_v28 = vpop.eup %2223 }
 0x159   : > { %v583_v29 = vmul.f32 %v2224_v28, %v567_v8 }
 0x15b   : > { %v591_v33 = vmul.f32 %v589_v30, %v583_v29 }
 0x15c   : > { %v2226_v31 = vpop.eup %2225 }
 0x15d   : > { %v584_v32 = vmul.f32 %v2226_v31, %v568_v12  ;;  %v599_v36 = vadd.f32 %v597_v34, %v591_v33 }
 0x15f   : > { %v592_v35 = vmul.f32 %v589_v30, %v584_v32 }
 0x161   : > { %v600_v37 = vadd.f32 %v597_v34, %v592_v35 }
 0x163   : > { %v601_v38 = vpack.c.bf16 %v600_v37, %v599_v36 }
 0x165   : > { %2020 = vmatmul.mubr.msk.bf16.vlgmr.msra.gmra.mrb[0].mxu0 %vm557_vm0, %v601_v38 }
 0x238   : > { %v662_v40 = vpop.f32.mrb[0].mxu0 }
 0x239   : > { %v2021_v41 = vpop.f32.mrb[1].mxu0  ;;  %v663_v43 = vadd.f32 %v1930_v39, %v662_v40 }
 0x23a   : > { %v665_v42 = vpop.f32.mrb[2].mxu0 }
 0x23b   : > { %v666_v44 = vadd.f32 %v1930_v39, %v665_v42  ;;  %v2022_v45 = vpop.f32.mrb[3].mxu0 }
 0x23d   : > { %v669_v46 = vpack.c.bf16 %v666_v44, %v663_v43 }
 0x23f   : > { %670 = vst.msk [vmem:[#allocation2] sm:$0xff] %vm557_vm0, %v669_v46  ;;  %672 = vrot.lane.b32.xlu0 %v669_v46, %s2387_s26 }
 0x2b1   : > { %v673_v47 = vpop.permute.xlu0 %672 }
 0x2b2   : > { %675 = vst.msk [vmem:[#allocation3] sm:$0xff] %vm557_vm0, %v673_v47 }
 0x2b3 PF: > { %s1934_s2 = sshll.u32 %s2367_s24, 3  ;;  %vm679_vm2 = vcmask 261120   ;;  %v695_v48 = vlaneseq  ;;  %v2255_v61 = vld [vmem:[%s3001_s4] sm:$0xff]   ;;  %v2388_v62 = vmov 0.0   ;;  %vm2389_vm3 = vmmov 0   ;;  %v2256_v63 = vld [vmem:[%s3001_s4 + $0x8] sm:$0xff]  }
 0x2b4   : > { %s677_s27 = scalar_lea.vmem %s2588_s23, %s1934_s2  ;;  %v778_v49 = vstv %s1934_s2  ;;  %2023 = vmatprep.subr.bf16.mxu0 %v2388_v62  ;;  %2027 = vmatprep.mubr.msk.bf16.mxu0 %vm2389_vm3, %v2388_v62  ;;  %v792_v2 = vld [vmem:[%s3005_s8] sm:$0xf]  ;;  %vm806_vm4 = vcmask 1043456   ;;  %vm802_vm5 = vcmask 64512   ;;  %v2390_v22 = vmov 1   ;;  %s2392_s20 = smov 120  }
 0x2b5   : > { %v2614_v50 = vld [vmem:[%s677_s27] sm:$0xff]  ;;  %v696_v51 = vshrl.u32 %v695_v48, 7  ;;  %v781_v52 = vand.u32 127, %v695_v48  ;;  %2024 = vmatpush3.bf16.msra.mxu0 %v2255_v61  ;;  %2049 = vmatprep.subr.bf16.mxu1 %v2388_v62  ;;  %v2639_v3 = vsel %vm806_vm4, %v792_v2, 0  ;;  %v2391_v23 = vmov 0   ;;  %s2399_s16 = smov 112  }
 0x2b6   : > { %v680_v53 = vsel %vm679_vm2, %v2614_v50, 0.0  ;;  %2025 = vmatprep.subr.bf16.mxu0 %v2388_v62  ;;  %2051 = vmatprep.mubr.msk.bf16.mxu1 %vm2389_vm3, %v2388_v62  ;;  %v2657_v16 = vld [vmem:[#allocation2] sm:$0xff]  ;;  %v2393_v30 = vmov 6   ;;  %v2394_v32 = vmov 2   ;;  %v2395_v36 = vmov 3   ;;  %s2401_s26 = smov 8  }
 0x2b7   : > { %v779_v54 = vadd.s32 %v778_v49, %v696_v51  ;;  %681 = vadd.xlane.f32.xlu0 %v680_v53  ;;  %2050 = vmatpush3.bf16.msra.mxu1 %v2639_v3  ;;  %v2643_v7 = vsub.s32 0, %v696_v51  ;;  %v900_v21 = vsel %vm802_vm5, %v2657_v16, 0  ;;  %v2677_v24 = vld [vmem:[%s3006_s9] ss:$0 sm:$0xff]  ;;  %v2396_v37 = vmov 4   ;;  %s2402_s2 = smov 16  }
 0x2b8   : > { %2061 = vmatprep.subr.bf16.mxu1 %v2388_v62  ;;  %2229 = vset.pattern.permute.xlu0 %v2390_v22  ;;  %v2397_v38 = vmov 5   ;;  %vm943_vm14 = vcmask 130048   ;;  %vm1200_vm15 = vcmask 130112   ;;  %vm1401_vm0 = vcmask 195712   ;;  %s2403_s27 = smov 24   ;;  %s3038_s23 = sld [smem:[#allocation18_spill]] }
 0x2b9   : > { %v2618_v55 = vsub.s32 %v781_v52, %v779_v54  ;;  %2026 = vmatpush3.bf16.msra.mxu0 %v2256_v63  ;;  %v698_v8 = vrot.slane %v2566_v0, %v2643_v7  ;;  %v705_v11 = vrot.slane %v2571_v1, %v2643_v7  ;;  %v1935_v0 = vld [vmem:[%s3002_s5] ss:$0 sm:$0xff]  ;;  %2227 = vset.pattern.permute.xlu1 %v2391_v23  ;;  %vm1602_vm1 = vcmask 261312  }
 0x2ba   : > { %2031 = vmatprep.subr.bf16.mxu0 %v2388_v62  ;;  %v783_v52 = vld [vmem:[%s547_s21] sm:$0x1]  ;;  %s2400_s21 = smov 104  }
 0x2bb   : > { %vm857_vm6 = vcmp.ge.s32.totalorder %v2618_v55, 3  ;;  %vm850_vm7 = vcmp.le.s32.totalorder %v2618_v55, 4294967293  ;;  %vm864_vm8 = vcmp.eq.s32.totalorder %v2618_v55, 4294967294  ;;  %vm871_vm9 = vcmp.eq.s32.totalorder %v2618_v55, 4294967295 }
 0x2bc   : > { %vm878_vm10 = vcmp.eq.s32.totalorder %v2618_v55, 0  ;;  %vm885_vm11 = vcmp.eq.s32.totalorder %v2618_v55, 1  ;;  %vm784_vm12 = vcmp.gt.f32.partialorder %v783_v52, 0.5  ;;  %vm892_vm13 = vcmp.eq.s32.totalorder %v2618_v55, 2 }
 0x344   : > { %v682_v56 = vpop.xlane.xlu0 %681 }
 0x345   : > { %v684_v57 = vmul.f32 0.03125, %v682_v56 }
 0x347   : > { %v685_v58 = vsub.f32 %v2614_v50, %v684_v57 }
 0x349   : > { %v686_v59 = vmul.f32 %v685_v58, %v685_v58 }
 0x34b   : > { %v687_v60 = vsel %vm679_vm2, %v686_v59, 0.0  ;;  %v2398_v59 = vmov -1e+30  }
 0x34c   : > { %688 = vadd.xlane.f32.xlu0 %v687_v60  ;;  %v785_v60 = vsel %vm784_vm12, 0.0, %v2398_v59 }
 0x3d9   : > { %v689_v4 = vpop.xlane.xlu0 %688 }
 0x3da   : > { %v690_v5 = vmul.f32 0.03125, %v689_v4 }
 0x3dc   : > { %v691_v6 = vadd.f32 1e-06, %v690_v5  ;;  %v2722_v5 = vrot.slane %v785_v60, %v2643_v7  ;;  %v2729_v7 = vld [vmem:[#allocation3] sm:$0xff] }
 0x3de   : > { %2267 = vrsqrt.f32 %v691_v6 }
 0x3e8   : > { %v2268_v9 = vpop.eup %2267 }
 0x3e9   : > { %v693_v10 = vmul.f32 %v2268_v9, %v685_v58 }
 0x3eb   : > { %v700_v12 = vmul.f32 %v698_v8, %v693_v10 }
 0x3ed   : > { %v707_v13 = vadd.f32 %v705_v11, %v700_v12 }
 0x3ef   : > { %v708_v14 = vpack.c.bf16 %v707_v13, %v707_v13 }
 0x3f1   : > { %2028 = vmatmul.mubr.msk.bf16.vlgmr.msra.gmra.mrb[0].mxu0 %vm679_vm2, %v708_v14 }
 0x3f2   : > { %2032 = vmatpush3.bf16.msra.mxu0 %v2639_v3  ;;  %2033 = vmatprep.mubr.msk.bf16.mxu0 %vm2389_vm3, %v2388_v62 }
 0x3f3   : > { %2037 = vmatprep.subr.bf16.mxu0 %v2388_v62 }
 0x4c4   : > { %v769_v15 = vpop.f32.mrb[0].mxu0 }
 0x4c5   : > { %v770_v1 = vadd.f32 %v1935_v0, %v769_v15  ;;  %v2029_v17 = vpop.f32.mrb[1].mxu0 }
 0x4c6   : > { %v772_v18 = vpop.f32.mrb[2].mxu0 }
 0x4c7   : > { %v2659_v19 = vpack.c.bf16 %v770_v1, %v770_v1  ;;  %v2030_v20 = vpop.f32.mrb[3].mxu0 }
 0x4c9   : > { %2034 = vmatmul.mubr.msk.bf16.vlgmr.msra.gmra.mrb[4].mxu0 %vm802_vm5, %v2659_v19 }
 0x4ca   : > { %2038 = vmatpush3.bf16.xpose.msra.mxu0 %v900_v21  ;;  %2039 = vmatprep.mubr.msk.bf16.mxu0 %vm2389_vm3, %v2388_v62 }
 0x4cb   : > { %2043 = vmatprep.subr.bf16.mxu0 %v2388_v62 }
 0x4d1   : > { %2040 = vmatmul.mubr.msk.bf16.vlgmr.msra.gmra.mrb[8].mxu0 %vm802_vm5, %v2659_v19 }
 0x4d2   : > { %2045 = vmatprep.mubr.msk.bf16.mxu0 %vm2389_vm3, %v2388_v62  ;;  %2044 = vmatpush3.bf16.msra.mxu0 %v2729_v7 }
 0x4d3   : > { %2055 = vmatprep.subr.bf16.mxu0 %v2388_v62 }
 0x59c   : > { %v844_v25 = vpop.f32.mrb[4].mxu0 }
 0x59d   : > { %v845_v26 = vadd.f32 %v2677_v24, %v844_v25  ;;  %v2035_v27 = vpop.f32.mrb[5].mxu0 }
 0x59e   : > { %v847_v28 = vpop.f32.mrb[6].mxu0 }
 0x59f   : > { %866 = vperm.xlu0 %2229, %v845_v26   ;;  %853 = vperm.xlu1 %2227, %v845_v26   ;;  %v2036_v29 = vpop.f32.mrb[7].mxu0 }
 0x5a3   : > { %1003 = vrot.lane.b32.xlu0 %v2659_v19, %s2392_s20  ;;  %2228 = vset.pattern.permute.xlu1 %v2393_v30 }
 0x5a4   : > { %859 = vperm.xlu1 %2228, %v845_v26   ;;  %v936_v31 = vpop.f32.mrb[8].mxu0  ;;  %2237 = vset.pattern.permute.xlu0 %v2394_v32 }
 0x5a5   : > { %v2041_v33 = vpop.f32.mrb[9].mxu0 }
 0x5a6   : > { %v939_v34 = vpop.f32.mrb[10].mxu0 }
 0x5a7   : > { %v2042_v35 = vpop.f32.mrb[11].mxu0 }
 0x5a8   : > { %2230 = vset.pattern.permute.xlu1 %v2394_v32 }
 0x5a9   : > { %873 = vperm.xlu1 %2230, %v845_v26  }
 0x5ad   : > { %2231 = vset.pattern.permute.xlu1 %v2395_v36 }
 0x5ae   : > { %880 = vperm.xlu1 %2231, %v845_v26  }
 0x5b2   : > { %2232 = vset.pattern.permute.xlu1 %v2396_v37 }
 0x5b3   : > { %887 = vperm.xlu1 %2232, %v845_v26  }
 0x5b7   : > { %2233 = vset.pattern.permute.xlu1 %v2397_v38 }
 0x5b8   : > { %894 = vperm.xlu1 %2233, %v845_v26  }
 0x5bc   : > { %2234 = vset.pattern.permute.xlu1 %v2391_v23 }
 0x61e   : > { %v867_v39 = vpop.permute.xlu0 %866  ;;  %v854_v40 = vpop.permute.xlu1 %853 }
 0x61f   : > { %v856_v45 = vsel %vm850_vm7, %v854_v40, 0.0  ;;  %v869_v48 = vsel %vm864_vm8, %v867_v39, 0.0 }
 0x622   : > { %v2689_v41 = vpop.permute.xlu0 %1003 }
 0x623   : > { %2052 = vmatmul.mubr.msk.bf16.vlgmr.msra.gmra.mrb[0].mxu1 %vm802_vm5, %v2689_v41  ;;  %v860_v42 = vpop.permute.xlu1 %859 }
 0x624   : > { %2063 = vmatprep.mubr.msk.bf16.mxu1 %vm2389_vm3, %v2388_v62  ;;  %v862_v43 = vsel %vm857_vm6, %v860_v42, 0.0 }
 0x625   : > { %v863_v46 = vadd.f32 %v862_v43, %v856_v45 }
 0x627   : > { %v870_v49 = vadd.f32 %v869_v48, %v863_v46 }
 0x628   : > { %v874_v44 = vpop.permute.xlu1 %873 }
 0x629   : > { %v876_v51 = vsel %vm871_vm9, %v874_v44, 0.0 }
 0x62a   : > { %v877_v56 = vadd.f32 %v876_v51, %v870_v49 }
 0x62d   : > { %v881_v47 = vpop.permute.xlu1 %880 }
 0x62e   : > { %v883_v53 = vsel %vm878_vm10, %v881_v47, 0.0 }
 0x62f   : > { %v884_v58 = vadd.f32 %v883_v53, %v877_v56 }
 0x632   : > { %v888_v54 = vpop.permute.xlu1 %887 }
 0x633   : > { %v890_v57 = vsel %vm885_vm11, %v888_v54, 0.0 }
 0x634   : > { %v891_v61 = vadd.f32 %v890_v57, %v884_v58 }
 0x637   : > { %v895_v63 = vpop.permute.xlu1 %894 }
 0x638   : > { %v897_v2 = vsel %vm892_vm13, %v895_v63, 0.0 }
 0x639   : > { %v898_v4 = vadd.f32 %v897_v2, %v891_v61 }
 0x63b   : > { %v937_v6 = vadd.f32 %v936_v31, %v898_v4 }
 0x63d   : > { %v942_v8 = vadd.f32 %v937_v6, %v2722_v5 }
 0x63f   : > { %v944_v9 = vsel %vm943_vm14, %v942_v8, -inf }
 0x640   : > { %945 = vmax.xlane.f32.xlu1 %v944_v9 }
 0x651   : > { %1091 = vrot.lane.b32.xlu1 %v2657_v16, %s2392_s20 }
 0x6cd   : > { %v946_v10 = vpop.xlane.xlu1 %945 }
 0x6ce   : > { %v947_v11 = vsub.f32 %v942_v8, %v946_v10 }
 0x6d0   : > { %v948_v12 = vmul.f32 1.442695, %v947_v11 }
 0x6d1   : > { %v1092_v26 = vpop.permute.xlu1 %1091 }
 0x6d2   : > { %2269 = vpow2.f32 %v948_v12  ;;  %v1094_v27 = vsel %vm802_vm5, %v1092_v26, 0 }
 0x6dc   : > { %v2270_v13 = vpop.eup %2269 }
 0x6dd   : > { %v950_v14 = vsel %vm943_vm14, %v2270_v13, 0.0 }
 0x6de   : > { %951 = vadd.xlane.f32.xlu0 %v950_v14 }
 0x6f6   : > { %v1042_v0 = vpop.f32.mrb[0].mxu1 }
 0x6f7   : > { %v1043_v15 = vadd.f32 %v2677_v24, %v1042_v0  ;;  %v2053_v1 = vpop.f32.mrb[1].mxu1 }
 0x6f8   : > { %v1045_v17 = vpop.f32.mrb[2].mxu1 }
 0x6f9   : > { %v2054_v18 = vpop.f32.mrb[3].mxu1  ;;  %1050 = vperm.xlu1 %2234, %v1043_v15   ;;  %1067 = vperm.xlu0 %2237, %v1043_v15  }
 0x6fd   : > { %2235 = vset.pattern.permute.xlu1 %v2393_v30  ;;  %1204 = vrot.lane.b32.xlu0 %v2659_v19, %s2399_s16 }
 0x6fe   : > { %1055 = vperm.xlu1 %2235, %v1043_v15   ;;  %2243 = vset.pattern.permute.xlu0 %v2390_v22 }
 0x702   : > { %2236 = vset.pattern.permute.xlu1 %v2390_v22 }
 0x703   : > { %1061 = vperm.xlu1 %2236, %v1043_v15  }
 0x707   : > { %2238 = vset.pattern.permute.xlu1 %v2395_v36 }
 0x708   : > { %1073 = vperm.xlu1 %2238, %v1043_v15  }
 0x70c   : > { %2239 = vset.pattern.permute.xlu1 %v2396_v37 }
 0x70d   : > { %1079 = vperm.xlu1 %2239, %v1043_v15  }
 0x711   : > { %2240 = vset.pattern.permute.xlu1 %v2397_v38 }
 0x712   : > { %1085 = vperm.xlu1 %2240, %v1043_v15  }
 0x716   : > { %2241 = vset.pattern.permute.xlu1 %v2391_v23 }
 0x76b   : > { %v952_v20 = vpop.xlane.xlu0 %951 }
 0x76c   : > { %2271 = vrcp.f32 %v952_v20 }
 0x776   : > { %v2272_v21 = vpop.eup %2271 }
 0x777   : > { %v954_v25 = vmul.f32 %v2272_v21, %v2270_v13 }
 0x778   : > { %v1068_v28 = vpop.permute.xlu0 %1067  ;;  %v1051_v31 = vpop.permute.xlu1 %1050 }
 0x779   : > { %v955_v22 = vpack.c.bf16 %v954_v25, %v954_v25  ;;  %v1053_v40 = vsel %vm850_vm7, %v1051_v31, 0.0  ;;  %v1070_v45 = vsel %vm871_vm9, %v1068_v28, 0.0 }
 0x77b   : > { %2046 = vmatmul.mubr.msk.bf16.vlgmr.msra.gmra.mrb[12].mxu0 %vm943_vm14, %v955_v22 }
 0x77c   : > { %2056 = vmatpush3.bf16.xpose.msra.mxu0 %v1094_v27  ;;  %2057 = vmatprep.mubr.msk.bf16.mxu0 %vm2389_vm3, %v2388_v62  ;;  %v2754_v29 = vpop.permute.xlu0 %1204 }
 0x77d   : > { %2067 = vmatprep.subr.bf16.mxu0 %v2388_v62  ;;  %v1056_v33 = vpop.permute.xlu1 %1055 }
 0x77e   : > { %v1058_v39 = vsel %vm857_vm6, %v1056_v33, 0.0 }
 0x77f   : > { %v1059_v42 = vadd.f32 %v1058_v39, %v1053_v40 }
 0x782   : > { %v1062_v34 = vpop.permute.xlu1 %1061 }
 0x783   : > { %2058 = vmatmul.mubr.msk.bf16.vlgmr.msra.gmra.mrb[16].mxu0 %vm802_vm5, %v2689_v41  ;;  %v1064_v41 = vsel %vm864_vm8, %v1062_v34, 0.0 }
 0x784   : > { %2068 = vmatpush3.bf16.msra.mxu0 %v2639_v3  ;;  %2069 = vmatprep.mubr.msk.bf16.mxu0 %vm2389_vm3, %v2388_v62  ;;  %v1065_v43 = vadd.f32 %v1064_v41, %v1059_v42 }
 0x785   : > { %2079 = vmatprep.subr.bf16.mxu0 %v2388_v62 }
 0x786   : > { %v1071_v46 = vadd.f32 %v1070_v45, %v1065_v43 }
 0x787   : > { %v1074_v35 = vpop.permute.xlu1 %1073 }
 0x788   : > { %v1076_v47 = vsel %vm878_vm10, %v1074_v35, 0.0 }
 0x789   : > { %v1077_v54 = vadd.f32 %v1076_v47, %v1071_v46 }
 0x78b   : > { %2070 = vmatmul.mubr.msk.bf16.vlgmr.msra.gmra.mrb[20].mxu0 %vm802_vm5, %v2754_v29 }
 0x78c   : > { %2081 = vmatprep.mubr.msk.bf16.mxu0 %vm2389_vm3, %v2388_v62  ;;  %v1080_v44 = vpop.permute.xlu1 %1079 }
 0x78d   : > { %v1082_v52 = vsel %vm885_vm11, %v1080_v44, 0.0 }
 0x78e   : > { %v1083_v58 = vadd.f32 %v1082_v52, %v1077_v54 }
 0x791   : > { %v1086_v49 = vpop.permute.xlu1 %1085 }
 0x792   : > { %v1088_v57 = vsel %vm892_vm13, %v1086_v49, 0.0 }
 0x793   : > { %v1089_v59 = vadd.f32 %v1088_v57, %v1083_v58 }
 0x84e   : > { %v993_v48 = vpop.f32.mrb[12].mxu0 }
 0x84f   : > { %999 = vst.msk [vmem:[#allocation4] sm:$0xff] %vm802_vm5, %v993_v48  ;;  %v2047_v51 = vpop.f32.mrb[13].mxu0 }
 0x850   : > { %v996_v53 = vpop.f32.mrb[14].mxu0 }
 0x851   : > { %v2048_v56 = vpop.f32.mrb[15].mxu0 }
 0x856   : > { %v1130_v60 = vpop.f32.mrb[16].mxu0 }
 0x857   : > { %v1131_v61 = vadd.f32 %v1130_v60, %v1089_v59  ;;  %v2059_v63 = vpop.f32.mrb[17].mxu0 }
 0x858   : > { %v1133_v2 = vpop.f32.mrb[18].mxu0 }
 0x859   : > { %v2060_v4 = vpop.f32.mrb[19].mxu0  ;;  %v1136_v6 = vadd.f32 %v1131_v61, %v2722_v5 }
 0x85b   : > { %v1137_v8 = vsel %vm943_vm14, %v1136_v6, -inf }
 0x85c   : > { %1138 = vmax.xlane.f32.xlu1 %v1137_v8 }
 0x85e   : > { %v1243_v9 = vpop.f32.mrb[20].mxu0 }
 0x85f   : > { %v2071_v10 = vpop.f32.mrb[21].mxu0  ;;  %v1244_v13 = vadd.f32 %v2677_v24, %v1243_v9 }
 0x860   : > { %v1246_v11 = vpop.f32.mrb[22].mxu0 }
 0x861   : > { %v2072_v12 = vpop.f32.mrb[23].mxu0 }
 0x86d   : > { %1150 = vrot.lane.b32.xlu1 %v2729_v7, %s2392_s20  ;;  %s1838_s20 = sshll.u32 %s539_s17, 4  ;;  %s2941_s20 = int_to_ptr.vmem [resolvable:$true] %s1838_s20 }
 0x871   : > { %1292 = vrot.lane.b32.xlu1 %v2657_v16, %s2399_s16 }
 0x875   : > { %1251 = vperm.xlu1 %2241, %v1244_v13  }
 0x879   : > { %2242 = vset.pattern.permute.xlu1 %v2393_v30 }
 0x87a   : > { %1256 = vperm.xlu1 %2242, %v1244_v13  }
 0x87e   : > { %2244 = vset.pattern.permute.xlu1 %v2394_v32 }
 0x87f   : > { %1268 = vperm.xlu1 %2244, %v1244_v13  }
 0x883   : > { %2245 = vset.pattern.permute.xlu1 %v2395_v36 }
 0x884   : > { %1274 = vperm.xlu1 %2245, %v1244_v13  }
 0x888   : > { %2246 = vset.pattern.permute.xlu1 %v2396_v37 }
 0x889   : > { %1280 = vperm.xlu1 %2246, %v1244_v13  }
 0x88d   : > { %2247 = vset.pattern.permute.xlu1 %v2397_v38 }
 0x88e   : > { %1286 = vperm.xlu1 %2247, %v1244_v13  }
 0x892   : > { %2248 = vset.pattern.permute.xlu1 %v2391_v23 }
 0x8e9   : > { %v1139_v14 = vpop.xlane.xlu1 %1138 }
 0x8ea   : > { %v1140_v0 = vsub.f32 %v1136_v6, %v1139_v14 }
 0x8ec   : > { %v1141_v15 = vmul.f32 1.442695, %v1140_v0 }
 0x8ed   : > { %v1151_v1 = vpop.permute.xlu1 %1150 }
 0x8ee   : > { %2273 = vpow2.f32 %v1141_v15  ;;  %2062 = vmatpush3.bf16.msra.mxu1 %v1151_v1 }
 0x8ef   : > { %2073 = vmatprep.subr.bf16.mxu1 %v2388_v62 }
 0x8f1   : > { %v1293_v25 = vpop.permute.xlu1 %1292 }
 0x8f2   : > { %v1295_v26 = vsel %vm802_vm5, %v1293_v25, 0 }
 0x8f5   : > { %v1252_v28 = vpop.permute.xlu1 %1251 }
 0x8f8   : > { %v2274_v17 = vpop.eup %2273 }
 0x8f9   : > { %v1143_v18 = vsel %vm943_vm14, %v2274_v17, 0.0  ;;  %v1257_v31 = vpop.permute.xlu1 %1256 }
 0x8fa   : > { %1144 = vadd.xlane.f32.xlu0 %v1143_v18 }
 0x8fe   : > { %v1269_v33 = vpop.permute.xlu1 %1268 }
 0x8ff   : > { %v1271_v41 = vsel %vm871_vm9, %v1269_v33, 0.0 }
 0x903   : > { %v1275_v39 = vpop.permute.xlu1 %1274 }
 0x904   : > { %v1277_v44 = vsel %vm878_vm10, %v1275_v39, 0.0 }
 0x908   : > { %v1281_v43 = vpop.permute.xlu1 %1280 }
 0x909   : > { %v1283_v48 = vsel %vm885_vm11, %v1281_v43, 0.0 }
 0x90d   : > { %v1287_v51 = vpop.permute.xlu1 %1286 }
 0x90e   : > { %v1289_v54 = vsel %vm892_vm13, %v1287_v51, 0.0 }
 0x910   : > { %1262 = vperm.xlu0 %2243, %v1244_v13  }
 0x914   : > { %1405 = vrot.lane.b32.xlu0 %v2659_v19, %s2400_s21 }
 0x987   : > { %v1145_v20 = vpop.xlane.xlu0 %1144 }
 0x988   : > { %2275 = vrcp.f32 %v1145_v20 }
 0x98f   : > { %v1263_v19 = vpop.permute.xlu0 %1262 }
 0x990   : > { %v1265_v34 = vsel %vm864_vm8, %v1263_v19, 0.0 }
 0x992   : > { %v2276_v23 = vpop.eup %2275 }
 0x993   : > { %v1147_v21 = vmul.f32 %v2276_v23, %v2274_v17  ;;  %v2803_v22 = vpop.permute.xlu0 %1405 }
 0x995   : > { %v1148_v27 = vpack.c.bf16 %v1147_v21, %v1147_v21 }
 0x997   : > { %2064 = vmatmul.mubr.msk.bf16.vlgmr.msra.gmra.mrb[4].mxu1 %vm943_vm14, %v1148_v27 }
 0x998   : > { %2074 = vmatpush3.bf16.xpose.msra.mxu1 %v1295_v26  ;;  %2075 = vmatprep.mubr.msk.bf16.mxu1 %vm2389_vm3, %v2388_v62 }
 0x999   : > { %2085 = vmatprep.subr.bf16.mxu1 %v2388_v62 }
 0x99f   : > { %2076 = vmatmul.mubr.msk.bf16.vlgmr.msra.gmra.mrb[8].mxu1 %vm802_vm5, %v2754_v29  ;;  %v1259_v29 = vsel %vm857_vm6, %v1257_v31, 0.0 }
 0x9a0   : > { %2086 = vmatpush3.bf16.msra.mxu1 %v2639_v3  ;;  %2087 = vmatprep.mubr.msk.bf16.mxu1 %vm2389_vm3, %v2388_v62  ;;  %v1254_v3 = vsel %vm850_vm7, %v1252_v28, 0.0 }
 0x9a1   : > { %2097 = vmatprep.subr.bf16.mxu1 %v2388_v62  ;;  %v1260_v35 = vadd.f32 %v1259_v29, %v1254_v3 }
 0x9a3   : > { %v1266_v40 = vadd.f32 %v1265_v34, %v1260_v35 }
 0x9a5   : > { %v1272_v42 = vadd.f32 %v1271_v41, %v1266_v40 }
 0x9a7   : > { %2088 = vmatmul.mubr.msk.bf16.vlgmr.msra.gmra.mrb[12].mxu1 %vm802_vm5, %v2803_v22  ;;  %v1278_v45 = vadd.f32 %v1277_v44, %v1272_v42 }
 0x9a8   : > { %2099 = vmatprep.mubr.msk.bf16.mxu1 %vm2389_vm3, %v2388_v62 }
 0x9a9   : > { %v1284_v53 = vadd.f32 %v1283_v48, %v1278_v45 }
 0x9ab   : > { %v1290_v56 = vadd.f32 %v1289_v54, %v1284_v53 }
 0xa6a   : > { %v2819_v46 = vpop.f32.mrb[4].mxu1 }
 0xa6b   : > { %v2065_v47 = vpop.f32.mrb[5].mxu1 }
 0xa6c   : > { %v1193_v49 = vpop.f32.mrb[6].mxu1 }
 0xa6d   : > { %v2066_v52 = vpop.f32.mrb[7].mxu1 }
 0xa72   : > { %v1331_v57 = vpop.f32.mrb[8].mxu1 }
 0xa73   : > { %v1332_v58 = vadd.f32 %v1331_v57, %v1290_v56  ;;  %v2077_v59 = vpop.f32.mrb[9].mxu1 }
 0xa74   : > { %v1334_v60 = vpop.f32.mrb[10].mxu1 }
 0xa75   : > { %v2078_v61 = vpop.f32.mrb[11].mxu1  ;;  %v1337_v63 = vadd.f32 %v1332_v58, %v2722_v5 }
 0xa77   : > { %v1338_v2 = vsel %vm943_vm14, %v1337_v63, -inf }
 0xa78   : > { %1339 = vmax.xlane.f32.xlu1 %v1338_v2 }
 0xa7a   : > { %v1444_v4 = vpop.f32.mrb[12].mxu1 }
 0xa7b   : > { %v2089_v6 = vpop.f32.mrb[13].mxu1  ;;  %v1445_v10 = vadd.f32 %v2677_v24, %v1444_v4 }
 0xa7c   : > { %v1447_v8 = vpop.f32.mrb[14].mxu1 }
 0xa7d   : > { %v2090_v9 = vpop.f32.mrb[15].mxu1 }
 0xa89   : > { %1351 = vrot.lane.b32.xlu1 %v2729_v7, %s2399_s16  ;;  %s3039_s16 = sld [smem:[#allocation19_spill]] }
 0xa8d   : > { %1493 = vrot.lane.b32.xlu1 %v2657_v16, %s2400_s21 }
 0xa91   : > { %1452 = vperm.xlu1 %2248, %v1445_v10  }
 0xa95   : > { %2249 = vset.pattern.permute.xlu1 %v2393_v30 }
 0xa96   : > { %1457 = vperm.xlu1 %2249, %v1445_v10  }
 0xa9a   : > { %2250 = vset.pattern.permute.xlu1 %v2394_v32 }
 0xa9b   : > { %1469 = vperm.xlu1 %2250, %v1445_v10  }
 0xa9f   : > { %2251 = vset.pattern.permute.xlu1 %v2395_v36 }
 0xaa0   : > { %1475 = vperm.xlu1 %2251, %v1445_v10  }
 0xaa4   : > { %2252 = vset.pattern.permute.xlu1 %v2396_v37 }
 0xaa5   : > { %1481 = vperm.xlu1 %2252, %v1445_v10  }
 0xaa9   : > { %2253 = vset.pattern.permute.xlu1 %v2397_v38 }
 0xaaa   : > { %1487 = vperm.xlu1 %2253, %v1445_v10  }
 0xb05   : > { %v1340_v11 = vpop.xlane.xlu1 %1339 }
 0xb06   : > { %v1341_v16 = vsub.f32 %v1337_v63, %v1340_v11 }
 0xb08   : > { %v1342_v12 = vmul.f32 1.442695, %v1341_v16 }
 0xb09   : > { %v1352_v24 = vpop.permute.xlu1 %1351 }
 0xb0a   : > { %2277 = vpow2.f32 %v1342_v12  ;;  %2080 = vmatpush3.bf16.msra.mxu0 %v1352_v24 }
 0xb0b   : > { %2091 = vmatprep.subr.bf16.mxu0 %v2388_v62 }
 0xb0d   : > { %v1494_v14 = vpop.permute.xlu1 %1493 }
 0xb0e   : > { %v1496_v0 = vsel %vm802_vm5, %v1494_v14, 0  ;;  %v2261_v14 = vld [vmem:[%s3011_s14 + $0x10] sm:$0xff]  }
 0xb14   : > { %v2278_v30 = vpop.eup %2277 }
 0xb15   : > { %v1344_v32 = vsel %vm943_vm14, %v2278_v30, 0.0 }
 0xb16   : > { %1345 = vadd.xlane.f32.xlu0 %v1344_v32 }
 0xb2c   : > { %1463 = vperm.xlu0 %2243, %v1445_v10  }
 0xb30   : > { %2254 = vset.pattern.permute.xlu0 %v2397_v38  ;;  %v1453_v38 = vpop.permute.xlu1 %1452 }
 0xb31   : > { %v1455_v23 = vsel %vm850_vm7, %v1453_v38, 0.0 }
 0xb34   : > { %v1458_v1 = vpop.permute.xlu1 %1457 }
 0xb35   : > { %v1460_v20 = vsel %vm857_vm6, %v1458_v1, 0.0 }
 0xb36   : > { %v1461_v25 = vadd.f32 %v1460_v20, %v1455_v23  ;;  %v1953_v20 = vld [vmem:[%s3008_s11] ss:$0 sm:$0xff] }
 0xb38   : > { %v1470_v17 = vpop.permute.xlu1 %1469 }
 0xb39   : > { %v1472_v19 = vsel %vm871_vm9, %v1470_v17, 0.0  ;;  %v1952_v17 = vld [vmem:[%s3007_s10] ss:$0 sm:$0xff] }
 0xb3c   : > { %v1476_v26 = vpop.permute.xlu1 %1475 }
 0xb3d   : > { %v1478_v31 = vsel %vm878_vm10, %v1476_v26, 0.0  ;;  %v2262_v26 = vld [vmem:[%s3011_s14 + $0x18] sm:$0xff]  }
 0xb40   : > { %v1482_v28 = vpop.permute.xlu1 %1481 }
 0xb41   : > { %v1484_v34 = vsel %vm885_vm11, %v1482_v28, 0.0  ;;  %v2266_v28 = vld [vmem:[%s3011_s14 + $0x38] sm:$0xff]  }
 0xb44   : > { %v1488_v39 = vpop.permute.xlu1 %1487 }
 0xb45   : > { %v1490_v42 = vsel %vm892_vm13, %v1488_v39, 0.0 }
 0xba3   : > { %v1346_v36 = vpop.xlane.xlu0 %1345 }
 0xba4   : > { %2279 = vrcp.f32 %v1346_v36  ;;  %v2257_v36 = vld [vmem:[%s3009_s12] sm:$0xff]  }
 0xbab   : > { %v1464_v18 = vpop.permute.xlu0 %1463 }
 0xbac   : > { %v1466_v21 = vsel %vm864_vm8, %v1464_v18, 0.0 }
 0xbad   : > { %v1467_v27 = vadd.f32 %v1466_v21, %v1461_v25 }
 0xbae   : > { %v2280_v37 = vpop.eup %2279 }
 0xbaf   : > { %v1348_v13 = vmul.f32 %v2280_v37, %v2278_v30  ;;  %v2259_v37 = vld [vmem:[%s3011_s14] sm:$0xff]  }
 0xbb1   : > { %v1349_v15 = vpack.c.bf16 %v1348_v13, %v1348_v13  ;;  %v2260_v13 = vld [vmem:[%s3011_s14 + $0x8] sm:$0xff]  }
 0xbb3   : > { %2082 = vmatmul.mubr.msk.bf16.vlgmr.msra.gmra.mrb[24].mxu0 %vm943_vm14, %v1349_v15 }
 0xbb4   : > { %2092 = vmatpush3.bf16.xpose.msra.mxu0 %v1496_v0  ;;  %2093 = vmatprep.mubr.msk.bf16.mxu0 %vm2389_vm3, %v2388_v62 }
 0xbb5   : > { %2103 = vmatprep.subr.bf16.mxu0 %v2388_v62 }
 0xbbb   : > { %2094 = vmatmul.mubr.msk.bf16.vlgmr.msra.gmra.mrb[28].mxu0 %vm802_vm5, %v2803_v22  ;;  %v1473_v22 = vadd.f32 %v1472_v19, %v1467_v27  ;;  %v2263_v27 = vld [vmem:[%s3011_s14 + $0x20] sm:$0xff]   ;;  %v2264_v19 = vld [vmem:[%s3011_s14 + $0x28] sm:$0xff]  }
 0xbbc   : > { %2107 = vmatprep.mubr.msk.bf16.mxu0 %vm2389_vm3, %v2388_v62  ;;  %2104 = vmatpush3.bf16.msra.mxu0 %v2257_v36 }
 0xbbd   : > { %v1479_v33 = vadd.f32 %v1478_v31, %v1473_v22  ;;  %2105 = vmatprep.subr.bf16.mxu0 %v2388_v62  ;;  %v2265_v22 = vld [vmem:[%s3011_s14 + $0x30] sm:$0xff]   ;;  %v1954_v31 = vld [vmem:[%s3010_s13] ss:$0 sm:$0xff] }
 0xbbf   : > { %v1485_v41 = vadd.f32 %v1484_v34, %v1479_v33 }
 0xbc1   : > { %v1491_v43 = vadd.f32 %v1490_v42, %v1485_v41 }
 0xc86   : > { %v1391_v29 = vpop.f32.mrb[24].mxu0 }
 0xc87   : > { %v2083_v3 = vpop.f32.mrb[25].mxu0 }
 0xc88   : > { %v1394_v35 = vpop.f32.mrb[26].mxu0 }
 0xc89   : > { %v2084_v40 = vpop.f32.mrb[27].mxu0 }
 0xc8e   : > { %v1532_v44 = vpop.f32.mrb[28].mxu0 }
 0xc8f   : > { %v1533_v45 = vadd.f32 %v1532_v44, %v1491_v43  ;;  %v2095_v47 = vpop.f32.mrb[29].mxu0 }
 0xc90   : > { %v1535_v48 = vpop.f32.mrb[30].mxu0 }
 0xc91   : > { %v2096_v49 = vpop.f32.mrb[31].mxu0  ;;  %v1538_v51 = vadd.f32 %v1533_v45, %v2722_v5  ;;  %v1966_v45 = vld [vmem:[%s3038_s23] ss:$0 sm:$0xff] }
 0xc93   : > { %v1539_v52 = vsel %vm943_vm14, %v1538_v51, -inf }
 0xc94   : > { %1540 = vmax.xlane.f32.xlu1 %v1539_v52 }
 0xca5   : > { %1197 = vrot.lane.b32.xlu1 %v2819_v46, %s2401_s26 }
 0xca9   : > { %1398 = vrot.lane.b32.xlu1 %v1391_v29, %s2402_s2 }
 0xd21   : > { %v1541_v53 = vpop.xlane.xlu1 %1540 }
 0xd22   : > { %v1542_v54 = vsub.f32 %v1538_v51, %v1541_v53 }
 0xd24   : > { %v1543_v55 = vmul.f32 1.442695, %v1542_v54 }
 0xd25   : > { %v1198_v56 = vpop.permute.xlu1 %1197 }
 0xd26   : > { %2281 = vpow2.f32 %v1543_v55  ;;  %1201 = vst.msk [vmem:[#allocation4] sm:$0xff] %vm1200_vm15, %v1198_v56 }
 0xd29   : > { %v1399_v57 = vpop.permute.xlu1 %1398 }
 0xd2a   : > { %1402 = vst.msk [vmem:[#allocation4] sm:$0xff] %vm1401_vm0, %v1399_v57 }
 0xd30   : > { %v2282_v58 = vpop.eup %2281 }
 0xd31   : > { %v1545_v5 = vsel %vm943_vm14, %v2282_v58, 0.0 }
 0xd32   : > { %1546 = vadd.xlane.f32.xlu0 %v1545_v5 }
 0xd48   : > { %1552 = vrot.lane.b32.xlu0 %v2729_v7, %s2400_s21  ;;  %s1968_s21 = sshll.u32 %s2371_s25, 1 }
 0xd49   : > { %s1834_s26 = sadd.s32 %s2367_s24, %s1968_s21  ;;  %s1823_s24 = scalar_lea.sflag [#allocation6], %s537_s30 }
 0xd4a   : > { %s1969_s0 = sshll.u32 %s1834_s26, 7  ;;  %s2289_s21 = scalar_lea.vmem %s2941_s20, 128 }
 0xd4b   : > { %s2939_s25 = scalar_lea.hbm %s3039_s16, %s1969_s0  ;;  %p2290_p0 = scmp.ne.s32.totalorder %s2941_s20, %s2289_s21 }
 0xd4c   : > { %s2404_s26 = smov [#allocation5]  }
 0xd4d   : > { %p2291_p1 = pnand %p2290_p0, %p2541_p3  ;;  %s2293_s2 = sshll.u32 %s2404_s26, 4  ;;  %s2294_s2 = int_to_ptr.vmem [resolvable:$false] %s2293_s2 }
 0xd4e   : > { %p2296_p4 = scmp.lt.s32.totalorder %s2941_s20, %s2294_s2 }
 0xd4f   : > { %p2292_p2 = pneg %p2291_p1 }
 0xdbf   : > { %v1547_v46 = vpop.xlane.xlu0 %1546 }
 0xdc0   : > { %2283 = vrcp.f32 %v1547_v46 }
 0xdc3   : > { %v1553_v59 = vpop.permute.xlu0 %1552 }
 0xdc4   : > { %2098 = vmatpush3.bf16.msra.mxu1 %v1553_v59 }
 0xdc5   : > { %2111 = vmatprep.subr.bf16.mxu1 %v2388_v62 }
 0xdca   : > { %v2284_v60 = vpop.eup %2283 }
 0xdcb   : > { %v1549_v61 = vmul.f32 %v2284_v60, %v2282_v58 }
 0xdcd   : > { %v1550_v63 = vpack.c.bf16 %v1549_v61, %v1549_v61 }
 0xdcf   : > { %2100 = vmatmul.mubr.msk.bf16.vlgmr.msra.gmra.mrb[16].mxu1 %vm943_vm14, %v1550_v63 }
 0xdd0   : > { %2127 = vmatprep.mubr.msk.bf16.mxu1 %vm2389_vm3, %v2388_v62  ;;  %2112 = vmatpush3.bf16.msra.mxu1 %v2259_v37 }
 0xdd1   : > { %2113 = vmatprep.subr.bf16.mxu1 %v2388_v62 }
 0xdd4   : > { %2114 = vmatpush3.bf16.msra.mxu1 %v2260_v13 }
 0xdd5   : > { %2115 = vmatprep.subr.bf16.mxu1 %v2388_v62 }
 0xdd8   : > { %2116 = vmatpush3.bf16.msra.mxu1 %v2261_v14 }
 0xdd9   : > { %2117 = vmatprep.subr.bf16.mxu1 %v2388_v62 }
 0xddc   : > { %2118 = vmatpush3.bf16.msra.mxu1 %v2262_v26 }
 0xddd   : > { %2119 = vmatprep.subr.bf16.mxu1 %v2388_v62 }
 0xde0   : > { %2120 = vmatpush3.bf16.msra.mxu1 %v2263_v27 }
 0xde1   : > { %2121 = vmatprep.subr.bf16.mxu1 %v2388_v62 }
 0xde4   : > { %2122 = vmatpush3.bf16.msra.mxu1 %v2264_v19 }
 0xde5   : > { %2123 = vmatprep.subr.bf16.mxu1 %v2388_v62 }
 0xde8   : > { %2124 = vmatpush3.bf16.msra.mxu1 %v2265_v22 }
 0xde9   : > { %2125 = vmatprep.subr.bf16.mxu1 %v2388_v62 }
 0xdec   : > { %2126 = vmatpush3.bf16.msra.mxu1 %v2266_v28 }
 0xea2   : > { %v1592_v2 = vpop.f32.mrb[16].mxu1 }
 0xea3   : > { %1599 = vrot.lane.b32.xlu0 %v1592_v2, %s2403_s27  ;;  %v2101_v4 = vpop.f32.mrb[17].mxu1  ;;  %s2295_s27 = scalar_lea.vmem %s2294_s2, 256 }
 0xea4   : > { %v1595_v6 = vpop.f32.mrb[18].mxu1  ;;  %p2297_p5 = scmp.lt.s32.totalorder %s2295_s27, %s2289_s21 }
 0xea5   : > { %v2102_v7 = vpop.f32.mrb[19].mxu1 }
 0xea6   : > { %p2298_p6 = por %p2297_p5, %p2296_p4 }
 0xea8   : > { %p2299_p7 = pnand %p2298_p6, %p2292_p2 }
 0xf15   : > { %v1600_v8 = vpop.permute.xlu0 %1599 }
 0xf16   : > { %1603 = vst.msk [vmem:[#allocation4] sm:$0xff] %vm1602_vm1, %v1600_v8 }
 0xf1d   : > { %v1604_v9 = vld [vmem:[#allocation4] sm:$0xff] }
 0xf1e   : > { %v2874_v10 = vadd.f32 %v1604_v9, %v2614_v50  ;;  %v2258_v50 = vld [vmem:[%s3009_s12 + $0x8] sm:$0xff]  }
 0xf1f   : > { %2106 = vmatpush3.bf16.msra.mxu0 %v2258_v50 }
 0xf20   : > { %v1608_v11 = vsel %vm679_vm2, %v2874_v10, 0.0 }
 0xf21   : > { %1609 = vadd.xlane.f32.xlu1 %v1608_v11 }
 0xfae   : > { %v1610_v16 = vpop.xlane.xlu1 %1609 }
 0xfaf   : > { %v1611_v12 = vmul.f32 0.03125, %v1610_v16 }
 0xfb1   : > { %v1612_v24 = vsub.f32 %v2874_v10, %v1611_v12 }
 0xfb3   : > { %v1613_v30 = vmul.f32 %v1612_v24, %v1612_v24 }
 0xfb5   : > { %v1614_v32 = vsel %vm679_vm2, %v1613_v30, 0.0 }
 0xfb6   : > { %1615 = vadd.xlane.f32.xlu0 %v1614_v32 }
0x1043   : > { %v1616_v0 = vpop.xlane.xlu0 %1615 }
0x1044   : > { %v1617_v15 = vmul.f32 0.03125, %v1616_v0 }
0x1046   : > { %v1618_v38 = vadd.f32 1e-06, %v1617_v15 }
0x1048   : > { %2285 = vrsqrt.f32 %v1618_v38 }
0x1052   : > { %v2286_v1 = vpop.eup %2285 }
0x1053   : > { %v1620_v18 = vmul.f32 %v2286_v1, %v1612_v24 }
0x1055   : > { %v1627_v23 = vmul.f32 %v1952_v17, %v1620_v18 }
0x1057   : > { %v1634_v21 = vadd.f32 %v1953_v20, %v1627_v23 }
0x1059   : > { %v1635_v25 = vpack.c.bf16 %v1634_v21, %v1634_v21 }
0x105b   : > { %2108 = vmatmul.mubr.msk.bf16.vlgmr.msra.gmra.mrb[32].mxu0 %vm679_vm2, %v1635_v25 }
0x112e   : > { %v1696_v33 = vpop.f32.mrb[32].mxu0 }
0x112f   : > { %v1697_v29 = vadd.f32 %v1954_v31, %v1696_v33  ;;  %v2109_v3 = vpop.f32.mrb[33].mxu0 }
0x1130   : > { %v1699_v34 = vpop.f32.mrb[34].mxu0 }
0x1131   : > { %v1703_v35 = vmul.f32 0.70710677, %v1697_v29  ;;  %v2110_v39 = vpop.f32.mrb[35].mxu0  ;;  %v1702_v40 = vmul.f32 0.5, %v1697_v29 }
0x1133   : > { %2287 = verf.f32 %v1703_v35 }
0x113d   : > { %v2288_v62 = vpop.eup %2287 }
0x113e   : > { %v1705_v41 = vadd.f32 1.0, %v2288_v62 }
0x1140   : > { %v1706_v42 = vmul.f32 %v1705_v41, %v1702_v40 }
0x1142   : > { %v1707_v43 = vpack.c.bf16 %v1706_v42, %v1706_v42 }
0x1144   : > { %2128 = vmatmul.mubr.bf16.vlgmr.msra.gmra.mrb[20].mxu1 %v1707_v43 }
0x1217   : > { %v1806_v44 = vpop.f32.mrb[20].mxu1 }
0x1218   : > { %v1812_v47 = vadd.f32 %v1806_v44, %v2874_v10  ;;  %v2129_v48 = vpop.f32.mrb[21].mxu1 }
0x1219   : > { %v1809_v49 = vpop.f32.mrb[22].mxu1 }
0x121a   : > { %v1820_v51 = vadd.f32 %v1966_v45, %v1812_v47  ;;  %v2130_v52 = vpop.f32.mrb[23].mxu1 }
0x121c   : > { %1821 = vst.msk [vmem:[%s539_s17] sm:$0xff] %vm679_vm2, %v1820_v51 }
0x121d   : > { %2302 = shalt.err (!%p2299_p7)
}
0x121e   : > { %s2303_s30 = scalar_lea.hbm %s2939_s25, 128  ;;  %s2307_s23 = scalar_lea.hbm %s3039_s16, 512 }
0x121f   : > { %p2304_p9 = scmp.ne.s32.totalorder %s2939_s25, %s2303_s30  ;;  %p2308_p12 = scmp.lt.u32.totalorder %s2939_s25, %s3039_s16 }
0x1220   : > { %p2309_p13 = scmp.lt.u32.totalorder %s2307_s23, %s2303_s30  ;;  %p2311_p1 = scmp.lt.u32.totalorder %s2303_s30, %s2939_s25 }
0x1221   : > { %p2305_p10 = pnand %p2304_p9, %p2541_p3 }
0x1222   : > { %p2310_p0 = por %p2309_p13, %p2308_p12 }
0x1223   : > { %p2306_p11 = pneg %p2305_p10 }
0x1224   : > { %p2312_p2 = por %p2311_p1, %p2310_p0 }
0x1226   : > { %p2313_p4 = pnand %p2312_p2, %p2306_p11 }
0x1228   : > { %2316 = shalt.err (!%p2313_p4)
}
0x1229   : > { %2131 = dma.vmem_to_hbm [thread:$0]  (%p2541_p3), %s2941_s20, 128, %s2939_s25, %s1823_s24  }
0x122a PF: > { %s3040_s29 = sld [smem:[#allocation8_spill]]  ;;  %p2137_p5 = scmp.ge.s32.totalorder %s2383_s28, 2 }
0x122c   : > { %p2134_p6 = pnand %p2137_p5, %p2550_p8 }
0x1230   : > { %s1850_s26 = sand.u32 1, %s3040_s29  }
0x1231   : > { %s1851_s2 = scalar_lea.sflag [#allocation6], %s1850_s26 }
0x1232   : > { %2350 = dma.done.wait (!%p2134_p6), %s1851_s2, 128  }
0x1233   : > { %2352 = vsyncadd (!%p2134_p6), %s1851_s2, 4294967168  ;;  %s29_s28 = sadd.s32 1, %s2383_s28   ;;  %s3042_s27 = sld [smem:[#allocation9_spill]] }
0x1234   : > { %p26_p7 = scmp.ge.s32.totalorder %s29_s28, 6   ;;  %s3043_s23 = sld [smem:[#allocation15_spill]] }
0x1235   : > { %s3044_s24 = sld [smem:[#allocation10_spill]]  ;;  %s3045_s25 = sld [smem:[#allocation11_spill]] }
0x1236   : > { %s3046_s26 = sld [smem:[#allocation12_spill]]  ;;  %s3047_s19 = sld [smem:[#allocation13_spill]] }
0x1237   : > { %s3048_s21 = smov %s2359_s22  ;;  %28 = sbr.rel (!%p26_p7) target bundleno = 10 (0xa), region = 127 }
0x1239   : > { %s3049_s22 = smov %s3042_s27 }
0x123c   : > { %s3050_s27 = smov %s3047_s19 }
0x123e   :  { %1856 = vsyncpa [#allocation6], 1 }
0x123f   :  { %1858 = vsyncpa [#allocation6 + $0x1], 1 }

</bundles_post_ra>
